<compile_context>
chip_gen: v5e
topology: v5e:2x2
jax: 0.10.0
libtpu: 0.0.40
codegen_flags: <defaults>
</compile_context>

<pallas_src>
import math
from typing import NamedTuple, Tuple

import jax
import jax.numpy as jnp
from jax.experimental import pallas as pl
from jax.experimental.pallas import tpu as pltpu

SUBLANE = 8    # f32 sublane granule
LANE = 128     # lane granule


def _round_up(n, m):
    return ((n + m - 1) // m) * m


class ModelMeta(NamedTuple):
    """Static (hashable) layout metadata for the packed weight slab."""
    F0: int
    H: int
    num_layers: int
    K: int
    K_pad: int
    W: int
    offsets: Tuple[int, ...]   # per layer: (w_ih, w_hh, b); then (w_fc, b_fc)


# ----------------------------------------------------------------------------
# Fused kernel builder.
#   x_ref  : (T*B_pad, F0)   time-major input slab (batch zero-padded to 8)
#   w_ref  : (rows, W)       packed weight slab (see prepare_params)
#   o_ref  : (B_pad, K_pad)  lane-dense output tile
#   xg_ref : (T, B_pad, 4H)  VMEM scratch for the hoisted layer-0 projection
# Gate order follows PyTorch nn.LSTM: [i, f, g, o]; g columns pre-scaled by 2.
# ----------------------------------------------------------------------------
def make_fused_lstm_fc_kernel(T, B_pad, meta: ModelMeta):
    F0, H, L, K_pad = meta.F0, meta.H, meta.num_layers, meta.K_pad
    G = 4 * H
    offs = meta.offsets
    lstm_offs = [offs[3 * l:3 * l + 3] for l in range(L)]
    wfc_off, bfc_off = offs[3 * L], offs[3 * L + 1]

    def kernel(x_ref, w_ref, o_ref, xg_ref):
        def load_bias(off, width):
            b = w_ref[off:off + SUBLANE, :width]        # stored replicated x8
            if B_pad != SUBLANE:
                b = jnp.broadcast_to(b[0:1, :], (B_pad, width))
            return b

        # --- Hoisted layer-0 input->gates projection: ONE MXU pass over all T,
        #     staged in VMEM scratch so the unrolled loop reloads (8, 4H)
        #     slices per wave instead of keeping the whole slab live in vregs.
        wih0_o, whh0_o, b0_o = lstm_offs[0]
        wih0 = w_ref[wih0_o:wih0_o + F0, :G]
        b0 = load_bias(b0_o, G)
        xg = jnp.dot(x_ref[...], wih0, preferred_element_type=jnp.float32)
        xg_ref[...] = xg.reshape(T, B_pad, G) + b0[None, :, :]

        # Loop-invariant recurrent weights (few vregs; loaded once).
        whh = [w_ref[o[1]:o[1] + H, :G] for o in lstm_offs]
        wih = [None] + [w_ref[lstm_offs[l][0]:lstm_offs[l][0] + H, :G]
                        for l in range(1, L)]
        bias = [None] + [load_bias(lstm_offs[l][2], G) for l in range(1, L)]

        def cell(gates, c):
            # Single EUP pass over the full gate tile: g columns were
            # pre-scaled by 2, so tanh(g) == 2*sigmoid(2g) - 1.
            s = jax.nn.sigmoid(gates)
            i_g = s[:, 0 * H:1 * H]
            f_g = s[:, 1 * H:2 * H]
            g_g = 2.0 * s[:, 2 * H:3 * H] - 1.0
            o_g = s[:, 3 * H:4 * H]
            c_new = f_g * c + i_g * g_g
            return o_g * jnp.tanh(c_new), c_new

        zeros = jnp.zeros((B_pad, H), jnp.float32)
        h = [zeros] * L
        c = [zeros] * L

        # --- Wavefront-interleaved recurrences.  At wave w, layer l computes
        # step t = w - l.  Layers are processed top-down so h[l-1] still holds
        # the previous wave's value when layer l consumes it; hence all matmuls
        # in a wave are mutually independent and the LLO scheduler can overlap
        # the per-layer chains (serial depth ~T+L-1 instead of T*L).
        for w in range(T + L - 1):
            for l in reversed(range(L)):
                t = w - l
                if t < 0 or t >= T:
                    continue
                if l == 0:
                    g = xg_ref[t] + jnp.dot(
                        h[0], whh[0], preferred_element_type=jnp.float32)
                else:
                    # Two back-to-back small matmuls (independent of each
                    # other) rather than a lane-concat + fused matmul: keeps
                    # XLU relayouts off the serial h-chain.
                    g = (jnp.dot(h[l - 1], wih[l],
                                 preferred_element_type=jnp.float32)
                         + jnp.dot(h[l], whh[l],
                                   preferred_element_type=jnp.float32)
                         + bias[l])
                h[l], c[l] = cell(g, c[l])

        # --- Final Linear on the top layer's last hidden state.  FC weights
        # are only pulled into vregs here (after the loop); the kernel's only
        # HBM store is a lane-dense, unmasked (B_pad, K_pad) tile.
        wfc = w_ref[wfc_off:wfc_off + H, :K_pad]
        bfc = load_bias(bfc_off, K_pad)
        o_ref[...] = (jnp.dot(h[L - 1], wfc, preferred_element_type=jnp.float32)
                      + bfc)

    return kernel


# ----------------------------------------------------------------------------
# Parameters: PyTorch-style init, then a ONE-TIME layout prep.
# ----------------------------------------------------------------------------
def init_params(key, input_size, hidden_size, num_layers, num_keys):
    """PyTorch nn.LSTM / nn.Linear style uniform(-1/sqrt(H), 1/sqrt(H)) init."""
    H = hidden_size
    bound = 1.0 / math.sqrt(H)
    params = {"lstm": [], "fc": None}
    for layer in range(num_layers):
        F = input_size if layer == 0 else H
        key, k1, k2, k3, k4 = jax.random.split(key, 5)
        w_ih = jax.random.uniform(k1, (4 * H, F), jnp.float32, -bound, bound)
        w_hh = jax.random.uniform(k2, (4 * H, H), jnp.float32, -bound, bound)
        b_ih = jax.random.uniform(k3, (4 * H,), jnp.float32, -bound, bound)
        b_hh = jax.random.uniform(k4, (4 * H,), jnp.float32, -bound, bound)
        params["lstm"].append((w_ih, w_hh, b_ih, b_hh))
    key, k1, k2 = jax.random.split(key, 3)
    fc_w = jax.random.uniform(k1, (num_keys, H), jnp.float32, -bound, bound)
    fc_b = jax.random.uniform(k2, (num_keys,), jnp.float32, -bound, bound)
    params["fc"] = (fc_w, fc_b)
    return params


def prepare_params(params):
    """One-time weight layout prep (outside the per-call hot path):
      * transpose all weights to (in, out) layout,
      * pre-sum b_ih + b_hh and replicate biases across 8 sublanes,
      * pre-scale g-gate columns/elements by 2 (single-sigmoid gate trick),
      * pack everything into ONE lane-padded (rows, W) f32 slab with
        8-row-aligned static offsets -> a single weight DMA at kernel entry.
    """
    H = params["lstm"][0][1].shape[1]
    G = 4 * H
    F0 = params["lstm"][0][0].shape[1]
    num_layers = len(params["lstm"])
    fc_w, fc_b = params["fc"]
    K = fc_w.shape[0]
    K_pad = _round_up(K, LANE)
    W = max(_round_up(G, LANE), K_pad)

    pieces, offsets, cur = [], [], 0

    def add(arr):
        nonlocal cur
        r, cc = arr.shape
        rp = _round_up(r, SUBLANE)
        buf = jnp.zeros((rp, W), jnp.float32).at[:r, :cc].set(arr)
        pieces.append(buf)
        offsets.append(cur)
        cur += rp

    def scale_g(mat):   # (rows, 4H), gate order [i|f|g|o]
        return mat.at[:, 2 * H:3 * H].multiply(2.0)

    for (w_ih, w_hh, b_ih, b_hh) in params["lstm"]:
        b = (b_ih + b_hh).at[2 * H:3 * H].multiply(2.0)
        add(scale_g(jnp.transpose(w_ih)))                  # (F, 4H)
        add(scale_g(jnp.transpose(w_hh)))                  # (H, 4H)
        add(jnp.tile(b[None, :], (SUBLANE, 1)))            # (8, 4H) replicated
    add(jnp.transpose(fc_w))                               # (H, K)
    add(jnp.tile(fc_b[None, :], (SUBLANE, 1)))             # (8, K) replicated

    slab = jnp.concatenate(pieces, axis=0)
    meta = ModelMeta(F0=F0, H=H, num_layers=num_layers, K=K, K_pad=K_pad, W=W,
                     offsets=tuple(offsets))
    return slab, meta


# ----------------------------------------------------------------------------
# Forward pass == ComponentModel.forward
# ----------------------------------------------------------------------------
def component_model_forward(x_btf, slab, meta: ModelMeta):
    """x_btf: (B, T, input_size) -> (B, num_keys)."""
    B, T, F0 = x_btf.shape
    assert F0 == meta.F0
    B_pad = _round_up(B, SUBLANE)

    # Time-major, batch zero-padded to the f32 sublane granule, flattened so
    # layer 0's x @ W_ih is a single MXU pass inside the kernel.
    x_tm = jnp.transpose(x_btf, (1, 0, 2)).astype(jnp.float32)        # (T,B,F0)
    x_pad = jnp.zeros((T, B_pad, F0), jnp.float32).at[:, :B, :].set(x_tm)
    x_flat = x_pad.reshape(T * B_pad, F0)

    kernel = make_fused_lstm_fc_kernel(T, B_pad, meta)
    vmem = pl.BlockSpec(memory_space=pltpu.MemorySpace.VMEM)
    out_pad = pl.pallas_call(
        kernel,
        out_shape=jax.ShapeDtypeStruct((B_pad, meta.K_pad), jnp.float32),
        in_specs=[vmem, vmem],            # x + one packed weight slab: 2 DMAs
        out_specs=vmem,
        scratch_shapes=[pltpu.VMEM((T, B_pad, 4 * meta.H), jnp.float32)],
    )(x_flat, slab)
    return out_pad[:B, :meta.K]


# ----------------------------------------------------------------------------
# Pure-JAX reference (matches PyTorch nn.LSTM + nn.Linear semantics)
# ----------------------------------------------------------------------------
def reference_forward(x_btf, params):
    B = x_btf.shape[0]
    h_seq = jnp.transpose(x_btf, (1, 0, 2)).astype(jnp.float32)  # (T, B, F)
    for (w_ih, w_hh, b_ih, b_hh) in params["lstm"]:
        H = w_hh.shape[1]

        def step(carry, x_t, w_ih=w_ih, w_hh=w_hh, b_ih=b_ih, b_hh=b_hh):
            h, c = carry
            g = x_t @ w_ih.T + b_ih + h @ w_hh.T + b_hh
            i, f, gg, o = jnp.split(g, 4, axis=-1)
            c = jax.nn.sigmoid(f) * c + jax.nn.sigmoid(i) * jnp.tanh(gg)
            h = jax.nn.sigmoid(o) * jnp.tanh(c)
            return (h, c), h

        init = (jnp.zeros((B, H), jnp.float32), jnp.zeros((B, H), jnp.float32))
        _, h_seq = jax.lax.scan(step, init, h_seq)
    fc_w, fc_b = params["fc"]
    return h_seq[-1] @ fc_w.T + fc_b


if __name__ == "__main__":
    B, T = 2, 8
    input_size, hidden_size, num_layers, num_keys = 16, 32, 2, 4

    key = jax.random.PRNGKey(0)
    key, xk = jax.random.split(key)
    x = jax.random.normal(xk, (B, T, input_size), jnp.float32)

    params = init_params(key, input_size, hidden_size, num_layers, num_keys)
    slab, meta = prepare_params(params)    # one-time layout prep

    forward = jax.jit(component_model_forward, static_argnums=(2,))
    out = jax.block_until_ready(forward(x, slab, meta))

    assert out.shape == (B, num_keys)
    assert out.dtype == jnp.float32

    ref = jax.block_until_ready(reference_forward(x, params))
    max_err = float(jnp.max(jnp.abs(out - ref)))
    assert max_err < 1e-4, f"mismatch vs reference: {max_err}"

    print("KERNEL_OK")
</pallas_src>

<mosaic_0001>
module attributes {stable_mosaic.version = 11 : i64} {
  func.func @kernel(%arg0: memref<64x16xf32, #tpu.memory_space<vmem>>, %arg1: memref<168x128xf32, #tpu.memory_space<vmem>>, %arg2: memref<8x128xf32, #tpu.memory_space<vmem>>, %arg3: memref<8x8x128xf32, #tpu.memory_space<vmem>>) attributes {dimension_semantics = [], scalar_prefetch = 0 : i64, scratch_operands = 1 : i64, tpu.core_type = #tpu.core_type<tc>} {
    %c0 = arith.constant 0 : index
    %c0_0 = arith.constant 0 : index
    %0 = vector.load %arg1[%c0, %c0_0] : memref<168x128xf32, #tpu.memory_space<vmem>>, vector<16x128xf32>
    %c48 = arith.constant 48 : index
    %c0_1 = arith.constant 0 : index
    %1 = vector.load %arg1[%c48, %c0_1] : memref<168x128xf32, #tpu.memory_space<vmem>>, vector<8x128xf32>
    %c0_2 = arith.constant 0 : index
    %c0_3 = arith.constant 0 : index
    %2 = vector.load %arg0[%c0_2, %c0_3] : memref<64x16xf32, #tpu.memory_space<vmem>>, vector<64x16xf32>
    %cst = arith.constant dense<0.000000e+00> : vector<64x128xf32>
    %3 = tpu.matmul %2, %0, %cst {dimension_numbers = #tpu.dot_dimension_numbers<[1], [0], [0], [1], [0, 0, 1, 1], [], []>} : vector<64x16xf32>, vector<16x128xf32>, vector<64x128xf32> -> vector<64x128xf32>
    %4 = vector.shape_cast %3 : vector<64x128xf32> to vector<8x8x128xf32>
    %5 = vector.shape_cast %1 : vector<8x128xf32> to vector<1x8x128xf32>
    %6 = vector.broadcast %5 : vector<1x8x128xf32> to vector<8x8x128xf32>
    %7 = arith.addf %4, %6 : vector<8x8x128xf32>
    %c0_4 = arith.constant 0 : index
    %c0_5 = arith.constant 0 : index
    %c0_6 = arith.constant 0 : index
    %8 = vector.load %arg3[%c0_4, %c0_5, %c0_6] : memref<8x8x128xf32, #tpu.memory_space<vmem>>, vector<8x8x128xf32>
    tpu.vector_store %arg3[%c0_4, %c0_5, %c0_6], %7 {strides = array<i32>} : memref<8x8x128xf32, #tpu.memory_space<vmem>>, vector<8x8x128xf32>,
    %c16 = arith.constant 16 : index
    %c0_7 = arith.constant 0 : index
    %9 = vector.load %arg1[%c16, %c0_7] : memref<168x128xf32, #tpu.memory_space<vmem>>, vector<32x128xf32>
    %c88 = arith.constant 88 : index
    %c0_8 = arith.constant 0 : index
    %10 = vector.load %arg1[%c88, %c0_8] : memref<168x128xf32, #tpu.memory_space<vmem>>, vector<32x128xf32>
    %c56 = arith.constant 56 : index
    %c0_9 = arith.constant 0 : index
    %11 = vector.load %arg1[%c56, %c0_9] : memref<168x128xf32, #tpu.memory_space<vmem>>, vector<32x128xf32>
    %c120 = arith.constant 120 : index
    %c0_10 = arith.constant 0 : index
    %12 = vector.load %arg1[%c120, %c0_10] : memref<168x128xf32, #tpu.memory_space<vmem>>, vector<8x128xf32>
    %cst_11 = arith.constant 0.000000e+00 : f32
    %13 = vector.broadcast %cst_11 : f32 to vector<8x32xf32>
    %c0_12 = arith.constant 0 : index
    %c0_13 = arith.constant 0 : index
    %c0_14 = arith.constant 0 : index
    %14 = vector.load %arg3[%c0_12, %c0_13, %c0_14] : memref<8x8x128xf32, #tpu.memory_space<vmem>>, vector<1x8x128xf32>
    %15 = vector.shape_cast %14 : vector<1x8x128xf32> to vector<8x128xf32>
    %cst_15 = arith.constant dense<0.000000e+00> : vector<8x128xf32>
    %16 = tpu.matmul %13, %9, %cst_15 {dimension_numbers = #tpu.dot_dimension_numbers<[1], [0], [0], [1], [0, 0, 1, 1], [], []>} : vector<8x32xf32>, vector<32x128xf32>, vector<8x128xf32> -> vector<8x128xf32>
    %17 = arith.addf %15, %16 : vector<8x128xf32>
    %18 = arith.negf %17 : vector<8x128xf32>
    %19 = math.exp %18 : vector<8x128xf32>
    %cst_16 = arith.constant 1.000000e+00 : f32
    %20 = vector.broadcast %cst_16 : f32 to vector<8x128xf32>
    %21 = arith.addf %20, %19 : vector<8x128xf32>
    %22 = arith.divf %20, %21 : vector<8x128xf32>
    %23 = vector.extract_strided_slice %22 {offsets = [0, 0], sizes = [8, 32], strides = [1, 1]} : vector<8x128xf32> to vector<8x32xf32>
    %24 = vector.extract_strided_slice %22 {offsets = [0, 32], sizes = [8, 32], strides = [1, 1]} : vector<8x128xf32> to vector<8x32xf32>
    %25 = vector.extract_strided_slice %22 {offsets = [0, 64], sizes = [8, 32], strides = [1, 1]} : vector<8x128xf32> to vector<8x32xf32>
    %cst_17 = arith.constant 2.000000e+00 : f32
    %26 = vector.broadcast %cst_17 : f32 to vector<8x32xf32>
    %27 = arith.mulf %26, %25 : vector<8x32xf32>
    %cst_18 = arith.constant 1.000000e+00 : f32
    %28 = vector.broadcast %cst_18 : f32 to vector<8x32xf32>
    %29 = arith.subf %27, %28 : vector<8x32xf32>
    %30 = vector.extract_strided_slice %22 {offsets = [0, 96], sizes = [8, 32], strides = [1, 1]} : vector<8x128xf32> to vector<8x32xf32>
    %31 = arith.mulf %24, %13 : vector<8x32xf32>
    %32 = arith.mulf %23, %29 : vector<8x32xf32>
    %33 = arith.addf %31, %32 : vector<8x32xf32>
    %34 = math.tanh %33 : vector<8x32xf32>
    %35 = arith.mulf %30, %34 : vector<8x32xf32>
    %cst_19 = arith.constant dense<0.000000e+00> : vector<8x128xf32>
    %36 = tpu.matmul %35, %11, %cst_19 {dimension_numbers = #tpu.dot_dimension_numbers<[1], [0], [0], [1], [0, 0, 1, 1], [], []>} : vector<8x32xf32>, vector<32x128xf32>, vector<8x128xf32> -> vector<8x128xf32>
    %cst_20 = arith.constant dense<0.000000e+00> : vector<8x128xf32>
    %37 = tpu.matmul %13, %10, %cst_20 {dimension_numbers = #tpu.dot_dimension_numbers<[1], [0], [0], [1], [0, 0, 1, 1], [], []>} : vector<8x32xf32>, vector<32x128xf32>, vector<8x128xf32> -> vector<8x128xf32>
    %38 = arith.addf %36, %37 : vector<8x128xf32>
    %39 = arith.addf %38, %12 : vector<8x128xf32>
    %40 = arith.negf %39 : vector<8x128xf32>
    %41 = math.exp %40 : vector<8x128xf32>
    %cst_21 = arith.constant 1.000000e+00 : f32
    %42 = vector.broadcast %cst_21 : f32 to vector<8x128xf32>
    %43 = arith.addf %42, %41 : vector<8x128xf32>
    %44 = arith.divf %42, %43 : vector<8x128xf32>
    %45 = vector.extract_strided_slice %44 {offsets = [0, 0], sizes = [8, 32], strides = [1, 1]} : vector<8x128xf32> to vector<8x32xf32>
    %46 = vector.extract_strided_slice %44 {offsets = [0, 32], sizes = [8, 32], strides = [1, 1]} : vector<8x128xf32> to vector<8x32xf32>
    %47 = vector.extract_strided_slice %44 {offsets = [0, 64], sizes = [8, 32], strides = [1, 1]} : vector<8x128xf32> to vector<8x32xf32>
    %cst_22 = arith.constant 2.000000e+00 : f32
    %48 = vector.broadcast %cst_22 : f32 to vector<8x32xf32>
    %49 = arith.mulf %48, %47 : vector<8x32xf32>
    %cst_23 = arith.constant 1.000000e+00 : f32
    %50 = vector.broadcast %cst_23 : f32 to vector<8x32xf32>
    %51 = arith.subf %49, %50 : vector<8x32xf32>
    %52 = vector.extract_strided_slice %44 {offsets = [0, 96], sizes = [8, 32], strides = [1, 1]} : vector<8x128xf32> to vector<8x32xf32>
    %53 = arith.mulf %46, %13 : vector<8x32xf32>
    %54 = arith.mulf %45, %51 : vector<8x32xf32>
    %55 = arith.addf %53, %54 : vector<8x32xf32>
    %56 = math.tanh %55 : vector<8x32xf32>
    %57 = arith.mulf %52, %56 : vector<8x32xf32>
    %c1 = arith.constant 1 : index
    %c0_24 = arith.constant 0 : index
    %c0_25 = arith.constant 0 : index
    %58 = vector.load %arg3[%c1, %c0_24, %c0_25] : memref<8x8x128xf32, #tpu.memory_space<vmem>>, vector<1x8x128xf32>
    %59 = vector.shape_cast %58 : vector<1x8x128xf32> to vector<8x128xf32>
    %cst_26 = arith.constant dense<0.000000e+00> : vector<8x128xf32>
    %60 = tpu.matmul %35, %9, %cst_26 {dimension_numbers = #tpu.dot_dimension_numbers<[1], [0], [0], [1], [0, 0, 1, 1], [], []>} : vector<8x32xf32>, vector<32x128xf32>, vector<8x128xf32> -> vector<8x128xf32>
    %61 = arith.addf %59, %60 : vector<8x128xf32>
    %62 = arith.negf %61 : vector<8x128xf32>
    %63 = math.exp %62 : vector<8x128xf32>
    %cst_27 = arith.constant 1.000000e+00 : f32
    %64 = vector.broadcast %cst_27 : f32 to vector<8x128xf32>
    %65 = arith.addf %64, %63 : vector<8x128xf32>
    %66 = arith.divf %64, %65 : vector<8x128xf32>
    %67 = vector.extract_strided_slice %66 {offsets = [0, 0], sizes = [8, 32], strides = [1, 1]} : vector<8x128xf32> to vector<8x32xf32>
    %68 = vector.extract_strided_slice %66 {offsets = [0, 32], sizes = [8, 32], strides = [1, 1]} : vector<8x128xf32> to vector<8x32xf32>
    %69 = vector.extract_strided_slice %66 {offsets = [0, 64], sizes = [8, 32], strides = [1, 1]} : vector<8x128xf32> to vector<8x32xf32>
    %cst_28 = arith.constant 2.000000e+00 : f32
    %70 = vector.broadcast %cst_28 : f32 to vector<8x32xf32>
    %71 = arith.mulf %70, %69 : vector<8x32xf32>
    %cst_29 = arith.constant 1.000000e+00 : f32
    %72 = vector.broadcast %cst_29 : f32 to vector<8x32xf32>
    %73 = arith.subf %71, %72 : vector<8x32xf32>
    %74 = vector.extract_strided_slice %66 {offsets = [0, 96], sizes = [8, 32], strides = [1, 1]} : vector<8x128xf32> to vector<8x32xf32>
    %75 = arith.mulf %68, %33 : vector<8x32xf32>
    %76 = arith.mulf %67, %73 : vector<8x32xf32>
    %77 = arith.addf %75, %76 : vector<8x32xf32>
    %78 = math.tanh %77 : vector<8x32xf32>
    %79 = arith.mulf %74, %78 : vector<8x32xf32>
    %cst_30 = arith.constant dense<0.000000e+00> : vector<8x128xf32>
    %80 = tpu.matmul %79, %11, %cst_30 {dimension_numbers = #tpu.dot_dimension_numbers<[1], [0], [0], [1], [0, 0, 1, 1], [], []>} : vector<8x32xf32>, vector<32x128xf32>, vector<8x128xf32> -> vector<8x128xf32>
    %cst_31 = arith.constant dense<0.000000e+00> : vector<8x128xf32>
    %81 = tpu.matmul %57, %10, %cst_31 {dimension_numbers = #tpu.dot_dimension_numbers<[1], [0], [0], [1], [0, 0, 1, 1], [], []>} : vector<8x32xf32>, vector<32x128xf32>, vector<8x128xf32> -> vector<8x128xf32>
    %82 = arith.addf %80, %81 : vector<8x128xf32>
    %83 = arith.addf %82, %12 : vector<8x128xf32>
    %84 = arith.negf %83 : vector<8x128xf32>
    %85 = math.exp %84 : vector<8x128xf32>
    %cst_32 = arith.constant 1.000000e+00 : f32
    %86 = vector.broadcast %cst_32 : f32 to vector<8x128xf32>
    %87 = arith.addf %86, %85 : vector<8x128xf32>
    %88 = arith.divf %86, %87 : vector<8x128xf32>
    %89 = vector.extract_strided_slice %88 {offsets = [0, 0], sizes = [8, 32], strides = [1, 1]} : vector<8x128xf32> to vector<8x32xf32>
    %90 = vector.extract_strided_slice %88 {offsets = [0, 32], sizes = [8, 32], strides = [1, 1]} : vector<8x128xf32> to vector<8x32xf32>
    %91 = vector.extract_strided_slice %88 {offsets = [0, 64], sizes = [8, 32], strides = [1, 1]} : vector<8x128xf32> to vector<8x32xf32>
    %cst_33 = arith.constant 2.000000e+00 : f32
    %92 = vector.broadcast %cst_33 : f32 to vector<8x32xf32>
    %93 = arith.mulf %92, %91 : vector<8x32xf32>
    %cst_34 = arith.constant 1.000000e+00 : f32
    %94 = vector.broadcast %cst_34 : f32 to vector<8x32xf32>
    %95 = arith.subf %93, %94 : vector<8x32xf32>
    %96 = vector.extract_strided_slice %88 {offsets = [0, 96], sizes = [8, 32], strides = [1, 1]} : vector<8x128xf32> to vector<8x32xf32>
    %97 = arith.mulf %90, %55 : vector<8x32xf32>
    %98 = arith.mulf %89, %95 : vector<8x32xf32>
    %99 = arith.addf %97, %98 : vector<8x32xf32>
    %100 = math.tanh %99 : vector<8x32xf32>
    %101 = arith.mulf %96, %100 : vector<8x32xf32>
    %c2 = arith.constant 2 : index
    %c0_35 = arith.constant 0 : index
    %c0_36 = arith.constant 0 : index
    %102 = vector.load %arg3[%c2, %c0_35, %c0_36] : memref<8x8x128xf32, #tpu.memory_space<vmem>>, vector<1x8x128xf32>
    %103 = vector.shape_cast %102 : vector<1x8x128xf32> to vector<8x128xf32>
    %cst_37 = arith.constant dense<0.000000e+00> : vector<8x128xf32>
    %104 = tpu.matmul %79, %9, %cst_37 {dimension_numbers = #tpu.dot_dimension_numbers<[1], [0], [0], [1], [0, 0, 1, 1], [], []>} : vector<8x32xf32>, vector<32x128xf32>, vector<8x128xf32> -> vector<8x128xf32>
    %105 = arith.addf %103, %104 : vector<8x128xf32>
    %106 = arith.negf %105 : vector<8x128xf32>
    %107 = math.exp %106 : vector<8x128xf32>
    %cst_38 = arith.constant 1.000000e+00 : f32
    %108 = vector.broadcast %cst_38 : f32 to vector<8x128xf32>
    %109 = arith.addf %108, %107 : vector<8x128xf32>
    %110 = arith.divf %108, %109 : vector<8x128xf32>
    %111 = vector.extract_strided_slice %110 {offsets = [0, 0], sizes = [8, 32], strides = [1, 1]} : vector<8x128xf32> to vector<8x32xf32>
    %112 = vector.extract_strided_slice %110 {offsets = [0, 32], sizes = [8, 32], strides = [1, 1]} : vector<8x128xf32> to vector<8x32xf32>
    %113 = vector.extract_strided_slice %110 {offsets = [0, 64], sizes = [8, 32], strides = [1, 1]} : vector<8x128xf32> to vector<8x32xf32>
    %cst_39 = arith.constant 2.000000e+00 : f32
    %114 = vector.broadcast %cst_39 : f32 to vector<8x32xf32>
    %115 = arith.mulf %114, %113 : vector<8x32xf32>
    %cst_40 = arith.constant 1.000000e+00 : f32
    %116 = vector.broadcast %cst_40 : f32 to vector<8x32xf32>
    %117 = arith.subf %115, %116 : vector<8x32xf32>
    %118 = vector.extract_strided_slice %110 {offsets = [0, 96], sizes = [8, 32], strides = [1, 1]} : vector<8x128xf32> to vector<8x32xf32>
    %119 = arith.mulf %112, %77 : vector<8x32xf32>
    %120 = arith.mulf %111, %117 : vector<8x32xf32>
    %121 = arith.addf %119, %120 : vector<8x32xf32>
    %122 = math.tanh %121 : vector<8x32xf32>
    %123 = arith.mulf %118, %122 : vector<8x32xf32>
    %cst_41 = arith.constant dense<0.000000e+00> : vector<8x128xf32>
    %124 = tpu.matmul %123, %11, %cst_41 {dimension_numbers = #tpu.dot_dimension_numbers<[1], [0], [0], [1], [0, 0, 1, 1], [], []>} : vector<8x32xf32>, vector<32x128xf32>, vector<8x128xf32> -> vector<8x128xf32>
    %cst_42 = arith.constant dense<0.000000e+00> : vector<8x128xf32>
    %125 = tpu.matmul %101, %10, %cst_42 {dimension_numbers = #tpu.dot_dimension_numbers<[1], [0], [0], [1], [0, 0, 1, 1], [], []>} : vector<8x32xf32>, vector<32x128xf32>, vector<8x128xf32> -> vector<8x128xf32>
    %126 = arith.addf %124, %125 : vector<8x128xf32>
    %127 = arith.addf %126, %12 : vector<8x128xf32>
    %128 = arith.negf %127 : vector<8x128xf32>
    %129 = math.exp %128 : vector<8x128xf32>
    %cst_43 = arith.constant 1.000000e+00 : f32
    %130 = vector.broadcast %cst_43 : f32 to vector<8x128xf32>
    %131 = arith.addf %130, %129 : vector<8x128xf32>
    %132 = arith.divf %130, %131 : vector<8x128xf32>
    %133 = vector.extract_strided_slice %132 {offsets = [0, 0], sizes = [8, 32], strides = [1, 1]} : vector<8x128xf32> to vector<8x32xf32>
    %134 = vector.extract_strided_slice %132 {offsets = [0, 32], sizes = [8, 32], strides = [1, 1]} : vector<8x128xf32> to vector<8x32xf32>
    %135 = vector.extract_strided_slice %132 {offsets = [0, 64], sizes = [8, 32], strides = [1, 1]} : vector<8x128xf32> to vector<8x32xf32>
    %cst_44 = arith.constant 2.000000e+00 : f32
    %136 = vector.broadcast %cst_44 : f32 to vector<8x32xf32>
    %137 = arith.mulf %136, %135 : vector<8x32xf32>
    %cst_45 = arith.constant 1.000000e+00 : f32
    %138 = vector.broadcast %cst_45 : f32 to vector<8x32xf32>
    %139 = arith.subf %137, %138 : vector<8x32xf32>
    %140 = vector.extract_strided_slice %132 {offsets = [0, 96], sizes = [8, 32], strides = [1, 1]} : vector<8x128xf32> to vector<8x32xf32>
    %141 = arith.mulf %134, %99 : vector<8x32xf32>
    %142 = arith.mulf %133, %139 : vector<8x32xf32>
    %143 = arith.addf %141, %142 : vector<8x32xf32>
    %144 = math.tanh %143 : vector<8x32xf32>
    %145 = arith.mulf %140, %144 : vector<8x32xf32>
    %c3 = arith.constant 3 : index
    %c0_46 = arith.constant 0 : index
    %c0_47 = arith.constant 0 : index
    %146 = vector.load %arg3[%c3, %c0_46, %c0_47] : memref<8x8x128xf32, #tpu.memory_space<vmem>>, vector<1x8x128xf32>
    %147 = vector.shape_cast %146 : vector<1x8x128xf32> to vector<8x128xf32>
    %cst_48 = arith.constant dense<0.000000e+00> : vector<8x128xf32>
    %148 = tpu.matmul %123, %9, %cst_48 {dimension_numbers = #tpu.dot_dimension_numbers<[1], [0], [0], [1], [0, 0, 1, 1], [], []>} : vector<8x32xf32>, vector<32x128xf32>, vector<8x128xf32> -> vector<8x128xf32>
    %149 = arith.addf %147, %148 : vector<8x128xf32>
    %150 = arith.negf %149 : vector<8x128xf32>
    %151 = math.exp %150 : vector<8x128xf32>
    %cst_49 = arith.constant 1.000000e+00 : f32
    %152 = vector.broadcast %cst_49 : f32 to vector<8x128xf32>
    %153 = arith.addf %152, %151 : vector<8x128xf32>
    %154 = arith.divf %152, %153 : vector<8x128xf32>
    %155 = vector.extract_strided_slice %154 {offsets = [0, 0], sizes = [8, 32], strides = [1, 1]} : vector<8x128xf32> to vector<8x32xf32>
    %156 = vector.extract_strided_slice %154 {offsets = [0, 32], sizes = [8, 32], strides = [1, 1]} : vector<8x128xf32> to vector<8x32xf32>
    %157 = vector.extract_strided_slice %154 {offsets = [0, 64], sizes = [8, 32], strides = [1, 1]} : vector<8x128xf32> to vector<8x32xf32>
    %cst_50 = arith.constant 2.000000e+00 : f32
    %158 = vector.broadcast %cst_50 : f32 to vector<8x32xf32>
    %159 = arith.mulf %158, %157 : vector<8x32xf32>
    %cst_51 = arith.constant 1.000000e+00 : f32
    %160 = vector.broadcast %cst_51 : f32 to vector<8x32xf32>
    %161 = arith.subf %159, %160 : vector<8x32xf32>
    %162 = vector.extract_strided_slice %154 {offsets = [0, 96], sizes = [8, 32], strides = [1, 1]} : vector<8x128xf32> to vector<8x32xf32>
    %163 = arith.mulf %156, %121 : vector<8x32xf32>
    %164 = arith.mulf %155, %161 : vector<8x32xf32>
    %165 = arith.addf %163, %164 : vector<8x32xf32>
    %166 = math.tanh %165 : vector<8x32xf32>
    %167 = arith.mulf %162, %166 : vector<8x32xf32>
    %cst_52 = arith.constant dense<0.000000e+00> : vector<8x128xf32>
    %168 = tpu.matmul %167, %11, %cst_52 {dimension_numbers = #tpu.dot_dimension_numbers<[1], [0], [0], [1], [0, 0, 1, 1], [], []>} : vector<8x32xf32>, vector<32x128xf32>, vector<8x128xf32> -> vector<8x128xf32>
    %cst_53 = arith.constant dense<0.000000e+00> : vector<8x128xf32>
    %169 = tpu.matmul %145, %10, %cst_53 {dimension_numbers = #tpu.dot_dimension_numbers<[1], [0], [0], [1], [0, 0, 1, 1], [], []>} : vector<8x32xf32>, vector<32x128xf32>, vector<8x128xf32> -> vector<8x128xf32>
    %170 = arith.addf %168, %169 : vector<8x128xf32>
    %171 = arith.addf %170, %12 : vector<8x128xf32>
    %172 = arith.negf %171 : vector<8x128xf32>
    %173 = math.exp %172 : vector<8x128xf32>
    %cst_54 = arith.constant 1.000000e+00 : f32
    %174 = vector.broadcast %cst_54 : f32 to vector<8x128xf32>
    %175 = arith.addf %174, %173 : vector<8x128xf32>
    %176 = arith.divf %174, %175 : vector<8x128xf32>
    %177 = vector.extract_strided_slice %176 {offsets = [0, 0], sizes = [8, 32], strides = [1, 1]} : vector<8x128xf32> to vector<8x32xf32>
    %178 = vector.extract_strided_slice %176 {offsets = [0, 32], sizes = [8, 32], strides = [1, 1]} : vector<8x128xf32> to vector<8x32xf32>
    %179 = vector.extract_strided_slice %176 {offsets = [0, 64], sizes = [8, 32], strides = [1, 1]} : vector<8x128xf32> to vector<8x32xf32>
    %cst_55 = arith.constant 2.000000e+00 : f32
    %180 = vector.broadcast %cst_55 : f32 to vector<8x32xf32>
    %181 = arith.mulf %180, %179 : vector<8x32xf32>
    %cst_56 = arith.constant 1.000000e+00 : f32
    %182 = vector.broadcast %cst_56 : f32 to vector<8x32xf32>
    %183 = arith.subf %181, %182 : vector<8x32xf32>
    %184 = vector.extract_strided_slice %176 {offsets = [0, 96], sizes = [8, 32], strides = [1, 1]} : vector<8x128xf32> to vector<8x32xf32>
    %185 = arith.mulf %178, %143 : vector<8x32xf32>
    %186 = arith.mulf %177, %183 : vector<8x32xf32>
    %187 = arith.addf %185, %186 : vector<8x32xf32>
    %188 = math.tanh %187 : vector<8x32xf32>
    %189 = arith.mulf %184, %188 : vector<8x32xf32>
    %c4 = arith.constant 4 : index
    %c0_57 = arith.constant 0 : index
    %c0_58 = arith.constant 0 : index
    %190 = vector.load %arg3[%c4, %c0_57, %c0_58] : memref<8x8x128xf32, #tpu.memory_space<vmem>>, vector<1x8x128xf32>
    %191 = vector.shape_cast %190 : vector<1x8x128xf32> to vector<8x128xf32>
    %cst_59 = arith.constant dense<0.000000e+00> : vector<8x128xf32>
    %192 = tpu.matmul %167, %9, %cst_59 {dimension_numbers = #tpu.dot_dimension_numbers<[1], [0], [0], [1], [0, 0, 1, 1], [], []>} : vector<8x32xf32>, vector<32x128xf32>, vector<8x128xf32> -> vector<8x128xf32>
    %193 = arith.addf %191, %192 : vector<8x128xf32>
    %194 = arith.negf %193 : vector<8x128xf32>
    %195 = math.exp %194 : vector<8x128xf32>
    %cst_60 = arith.constant 1.000000e+00 : f32
    %196 = vector.broadcast %cst_60 : f32 to vector<8x128xf32>
    %197 = arith.addf %196, %195 : vector<8x128xf32>
    %198 = arith.divf %196, %197 : vector<8x128xf32>
    %199 = vector.extract_strided_slice %198 {offsets = [0, 0], sizes = [8, 32], strides = [1, 1]} : vector<8x128xf32> to vector<8x32xf32>
    %200 = vector.extract_strided_slice %198 {offsets = [0, 32], sizes = [8, 32], strides = [1, 1]} : vector<8x128xf32> to vector<8x32xf32>
    %201 = vector.extract_strided_slice %198 {offsets = [0, 64], sizes = [8, 32], strides = [1, 1]} : vector<8x128xf32> to vector<8x32xf32>
    %cst_61 = arith.constant 2.000000e+00 : f32
    %202 = vector.broadcast %cst_61 : f32 to vector<8x32xf32>
    %203 = arith.mulf %202, %201 : vector<8x32xf32>
    %cst_62 = arith.constant 1.000000e+00 : f32
    %204 = vector.broadcast %cst_62 : f32 to vector<8x32xf32>
    %205 = arith.subf %203, %204 : vector<8x32xf32>
    %206 = vector.extract_strided_slice %198 {offsets = [0, 96], sizes = [8, 32], strides = [1, 1]} : vector<8x128xf32> to vector<8x32xf32>
    %207 = arith.mulf %200, %165 : vector<8x32xf32>
    %208 = arith.mulf %199, %205 : vector<8x32xf32>
    %209 = arith.addf %207, %208 : vector<8x32xf32>
    %210 = math.tanh %209 : vector<8x32xf32>
    %211 = arith.mulf %206, %210 : vector<8x32xf32>
    %cst_63 = arith.constant dense<0.000000e+00> : vector<8x128xf32>
    %212 = tpu.matmul %211, %11, %cst_63 {dimension_numbers = #tpu.dot_dimension_numbers<[1], [0], [0], [1], [0, 0, 1, 1], [], []>} : vector<8x32xf32>, vector<32x128xf32>, vector<8x128xf32> -> vector<8x128xf32>
    %cst_64 = arith.constant dense<0.000000e+00> : vector<8x128xf32>
    %213 = tpu.matmul %189, %10, %cst_64 {dimension_numbers = #tpu.dot_dimension_numbers<[1], [0], [0], [1], [0, 0, 1, 1], [], []>} : vector<8x32xf32>, vector<32x128xf32>, vector<8x128xf32> -> vector<8x128xf32>
    %214 = arith.addf %212, %213 : vector<8x128xf32>
    %215 = arith.addf %214, %12 : vector<8x128xf32>
    %216 = arith.negf %215 : vector<8x128xf32>
    %217 = math.exp %216 : vector<8x128xf32>
    %cst_65 = arith.constant 1.000000e+00 : f32
    %218 = vector.broadcast %cst_65 : f32 to vector<8x128xf32>
    %219 = arith.addf %218, %217 : vector<8x128xf32>
    %220 = arith.divf %218, %219 : vector<8x128xf32>
    %221 = vector.extract_strided_slice %220 {offsets = [0, 0], sizes = [8, 32], strides = [1, 1]} : vector<8x128xf32> to vector<8x32xf32>
    %222 = vector.extract_strided_slice %220 {offsets = [0, 32], sizes = [8, 32], strides = [1, 1]} : vector<8x128xf32> to vector<8x32xf32>
    %223 = vector.extract_strided_slice %220 {offsets = [0, 64], sizes = [8, 32], strides = [1, 1]} : vector<8x128xf32> to vector<8x32xf32>
    %cst_66 = arith.constant 2.000000e+00 : f32
    %224 = vector.broadcast %cst_66 : f32 to vector<8x32xf32>
    %225 = arith.mulf %224, %223 : vector<8x32xf32>
    %cst_67 = arith.constant 1.000000e+00 : f32
    %226 = vector.broadcast %cst_67 : f32 to vector<8x32xf32>
    %227 = arith.subf %225, %226 : vector<8x32xf32>
    %228 = vector.extract_strided_slice %220 {offsets = [0, 96], sizes = [8, 32], strides = [1, 1]} : vector<8x128xf32> to vector<8x32xf32>
    %229 = arith.mulf %222, %187 : vector<8x32xf32>
    %230 = arith.mulf %221, %227 : vector<8x32xf32>
    %231 = arith.addf %229, %230 : vector<8x32xf32>
    %232 = math.tanh %231 : vector<8x32xf32>
    %233 = arith.mulf %228, %232 : vector<8x32xf32>
    %c5 = arith.constant 5 : index
    %c0_68 = arith.constant 0 : index
    %c0_69 = arith.constant 0 : index
    %234 = vector.load %arg3[%c5, %c0_68, %c0_69] : memref<8x8x128xf32, #tpu.memory_space<vmem>>, vector<1x8x128xf32>
    %235 = vector.shape_cast %234 : vector<1x8x128xf32> to vector<8x128xf32>
    %cst_70 = arith.constant dense<0.000000e+00> : vector<8x128xf32>
    %236 = tpu.matmul %211, %9, %cst_70 {dimension_numbers = #tpu.dot_dimension_numbers<[1], [0], [0], [1], [0, 0, 1, 1], [], []>} : vector<8x32xf32>, vector<32x128xf32>, vector<8x128xf32> -> vector<8x128xf32>
    %237 = arith.addf %235, %236 : vector<8x128xf32>
    %238 = arith.negf %237 : vector<8x128xf32>
    %239 = math.exp %238 : vector<8x128xf32>
    %cst_71 = arith.constant 1.000000e+00 : f32
    %240 = vector.broadcast %cst_71 : f32 to vector<8x128xf32>
    %241 = arith.addf %240, %239 : vector<8x128xf32>
    %242 = arith.divf %240, %241 : vector<8x128xf32>
    %243 = vector.extract_strided_slice %242 {offsets = [0, 0], sizes = [8, 32], strides = [1, 1]} : vector<8x128xf32> to vector<8x32xf32>
    %244 = vector.extract_strided_slice %242 {offsets = [0, 32], sizes = [8, 32], strides = [1, 1]} : vector<8x128xf32> to vector<8x32xf32>
    %245 = vector.extract_strided_slice %242 {offsets = [0, 64], sizes = [8, 32], strides = [1, 1]} : vector<8x128xf32> to vector<8x32xf32>
    %cst_72 = arith.constant 2.000000e+00 : f32
    %246 = vector.broadcast %cst_72 : f32 to vector<8x32xf32>
    %247 = arith.mulf %246, %245 : vector<8x32xf32>
    %cst_73 = arith.constant 1.000000e+00 : f32
    %248 = vector.broadcast %cst_73 : f32 to vector<8x32xf32>
    %249 = arith.subf %247, %248 : vector<8x32xf32>
    %250 = vector.extract_strided_slice %242 {offsets = [0, 96], sizes = [8, 32], strides = [1, 1]} : vector<8x128xf32> to vector<8x32xf32>
    %251 = arith.mulf %244, %209 : vector<8x32xf32>
    %252 = arith.mulf %243, %249 : vector<8x32xf32>
    %253 = arith.addf %251, %252 : vector<8x32xf32>
    %254 = math.tanh %253 : vector<8x32xf32>
    %255 = arith.mulf %250, %254 : vector<8x32xf32>
    %cst_74 = arith.constant dense<0.000000e+00> : vector<8x128xf32>
    %256 = tpu.matmul %255, %11, %cst_74 {dimension_numbers = #tpu.dot_dimension_numbers<[1], [0], [0], [1], [0, 0, 1, 1], [], []>} : vector<8x32xf32>, vector<32x128xf32>, vector<8x128xf32> -> vector<8x128xf32>
    %cst_75 = arith.constant dense<0.000000e+00> : vector<8x128xf32>
    %257 = tpu.matmul %233, %10, %cst_75 {dimension_numbers = #tpu.dot_dimension_numbers<[1], [0], [0], [1], [0, 0, 1, 1], [], []>} : vector<8x32xf32>, vector<32x128xf32>, vector<8x128xf32> -> vector<8x128xf32>
    %258 = arith.addf %256, %257 : vector<8x128xf32>
    %259 = arith.addf %258, %12 : vector<8x128xf32>
    %260 = arith.negf %259 : vector<8x128xf32>
    %261 = math.exp %260 : vector<8x128xf32>
    %cst_76 = arith.constant 1.000000e+00 : f32
    %262 = vector.broadcast %cst_76 : f32 to vector<8x128xf32>
    %263 = arith.addf %262, %261 : vector<8x128xf32>
    %264 = arith.divf %262, %263 : vector<8x128xf32>
    %265 = vector.extract_strided_slice %264 {offsets = [0, 0], sizes = [8, 32], strides = [1, 1]} : vector<8x128xf32> to vector<8x32xf32>
    %266 = vector.extract_strided_slice %264 {offsets = [0, 32], sizes = [8, 32], strides = [1, 1]} : vector<8x128xf32> to vector<8x32xf32>
    %267 = vector.extract_strided_slice %264 {offsets = [0, 64], sizes = [8, 32], strides = [1, 1]} : vector<8x128xf32> to vector<8x32xf32>
    %cst_77 = arith.constant 2.000000e+00 : f32
    %268 = vector.broadcast %cst_77 : f32 to vector<8x32xf32>
    %269 = arith.mulf %268, %267 : vector<8x32xf32>
    %cst_78 = arith.constant 1.000000e+00 : f32
    %270 = vector.broadcast %cst_78 : f32 to vector<8x32xf32>
    %271 = arith.subf %269, %270 : vector<8x32xf32>
    %272 = vector.extract_strided_slice %264 {offsets = [0, 96], sizes = [8, 32], strides = [1, 1]} : vector<8x128xf32> to vector<8x32xf32>
    %273 = arith.mulf %266, %231 : vector<8x32xf32>
    %274 = arith.mulf %265, %271 : vector<8x32xf32>
    %275 = arith.addf %273, %274 : vector<8x32xf32>
    %276 = math.tanh %275 : vector<8x32xf32>
    %277 = arith.mulf %272, %276 : vector<8x32xf32>
    %c6 = arith.constant 6 : index
    %c0_79 = arith.constant 0 : index
    %c0_80 = arith.constant 0 : index
    %278 = vector.load %arg3[%c6, %c0_79, %c0_80] : memref<8x8x128xf32, #tpu.memory_space<vmem>>, vector<1x8x128xf32>
    %279 = vector.shape_cast %278 : vector<1x8x128xf32> to vector<8x128xf32>
    %cst_81 = arith.constant dense<0.000000e+00> : vector<8x128xf32>
    %280 = tpu.matmul %255, %9, %cst_81 {dimension_numbers = #tpu.dot_dimension_numbers<[1], [0], [0], [1], [0, 0, 1, 1], [], []>} : vector<8x32xf32>, vector<32x128xf32>, vector<8x128xf32> -> vector<8x128xf32>
    %281 = arith.addf %279, %280 : vector<8x128xf32>
    %282 = arith.negf %281 : vector<8x128xf32>
    %283 = math.exp %282 : vector<8x128xf32>
    %cst_82 = arith.constant 1.000000e+00 : f32
    %284 = vector.broadcast %cst_82 : f32 to vector<8x128xf32>
    %285 = arith.addf %284, %283 : vector<8x128xf32>
    %286 = arith.divf %284, %285 : vector<8x128xf32>
    %287 = vector.extract_strided_slice %286 {offsets = [0, 0], sizes = [8, 32], strides = [1, 1]} : vector<8x128xf32> to vector<8x32xf32>
    %288 = vector.extract_strided_slice %286 {offsets = [0, 32], sizes = [8, 32], strides = [1, 1]} : vector<8x128xf32> to vector<8x32xf32>
    %289 = vector.extract_strided_slice %286 {offsets = [0, 64], sizes = [8, 32], strides = [1, 1]} : vector<8x128xf32> to vector<8x32xf32>
    %cst_83 = arith.constant 2.000000e+00 : f32
    %290 = vector.broadcast %cst_83 : f32 to vector<8x32xf32>
    %291 = arith.mulf %290, %289 : vector<8x32xf32>
    %cst_84 = arith.constant 1.000000e+00 : f32
    %292 = vector.broadcast %cst_84 : f32 to vector<8x32xf32>
    %293 = arith.subf %291, %292 : vector<8x32xf32>
    %294 = vector.extract_strided_slice %286 {offsets = [0, 96], sizes = [8, 32], strides = [1, 1]} : vector<8x128xf32> to vector<8x32xf32>
    %295 = arith.mulf %288, %253 : vector<8x32xf32>
    %296 = arith.mulf %287, %293 : vector<8x32xf32>
    %297 = arith.addf %295, %296 : vector<8x32xf32>
    %298 = math.tanh %297 : vector<8x32xf32>
    %299 = arith.mulf %294, %298 : vector<8x32xf32>
    %cst_85 = arith.constant dense<0.000000e+00> : vector<8x128xf32>
    %300 = tpu.matmul %299, %11, %cst_85 {dimension_numbers = #tpu.dot_dimension_numbers<[1], [0], [0], [1], [0, 0, 1, 1], [], []>} : vector<8x32xf32>, vector<32x128xf32>, vector<8x128xf32> -> vector<8x128xf32>
    %cst_86 = arith.constant dense<0.000000e+00> : vector<8x128xf32>
    %301 = tpu.matmul %277, %10, %cst_86 {dimension_numbers = #tpu.dot_dimension_numbers<[1], [0], [0], [1], [0, 0, 1, 1], [], []>} : vector<8x32xf32>, vector<32x128xf32>, vector<8x128xf32> -> vector<8x128xf32>
    %302 = arith.addf %300, %301 : vector<8x128xf32>
    %303 = arith.addf %302, %12 : vector<8x128xf32>
    %304 = arith.negf %303 : vector<8x128xf32>
    %305 = math.exp %304 : vector<8x128xf32>
    %cst_87 = arith.constant 1.000000e+00 : f32
    %306 = vector.broadcast %cst_87 : f32 to vector<8x128xf32>
    %307 = arith.addf %306, %305 : vector<8x128xf32>
    %308 = arith.divf %306, %307 : vector<8x128xf32>
    %309 = vector.extract_strided_slice %308 {offsets = [0, 0], sizes = [8, 32], strides = [1, 1]} : vector<8x128xf32> to vector<8x32xf32>
    %310 = vector.extract_strided_slice %308 {offsets = [0, 32], sizes = [8, 32], strides = [1, 1]} : vector<8x128xf32> to vector<8x32xf32>
    %311 = vector.extract_strided_slice %308 {offsets = [0, 64], sizes = [8, 32], strides = [1, 1]} : vector<8x128xf32> to vector<8x32xf32>
    %cst_88 = arith.constant 2.000000e+00 : f32
    %312 = vector.broadcast %cst_88 : f32 to vector<8x32xf32>
    %313 = arith.mulf %312, %311 : vector<8x32xf32>
    %cst_89 = arith.constant 1.000000e+00 : f32
    %314 = vector.broadcast %cst_89 : f32 to vector<8x32xf32>
    %315 = arith.subf %313, %314 : vector<8x32xf32>
    %316 = vector.extract_strided_slice %308 {offsets = [0, 96], sizes = [8, 32], strides = [1, 1]} : vector<8x128xf32> to vector<8x32xf32>
    %317 = arith.mulf %310, %275 : vector<8x32xf32>
    %318 = arith.mulf %309, %315 : vector<8x32xf32>
    %319 = arith.addf %317, %318 : vector<8x32xf32>
    %320 = math.tanh %319 : vector<8x32xf32>
    %321 = arith.mulf %316, %320 : vector<8x32xf32>
    %c7 = arith.constant 7 : index
    %c0_90 = arith.constant 0 : index
    %c0_91 = arith.constant 0 : index
    %322 = vector.load %arg3[%c7, %c0_90, %c0_91] : memref<8x8x128xf32, #tpu.memory_space<vmem>>, vector<1x8x128xf32>
    %323 = vector.shape_cast %322 : vector<1x8x128xf32> to vector<8x128xf32>
    %cst_92 = arith.constant dense<0.000000e+00> : vector<8x128xf32>
    %324 = tpu.matmul %299, %9, %cst_92 {dimension_numbers = #tpu.dot_dimension_numbers<[1], [0], [0], [1], [0, 0, 1, 1], [], []>} : vector<8x32xf32>, vector<32x128xf32>, vector<8x128xf32> -> vector<8x128xf32>
    %325 = arith.addf %323, %324 : vector<8x128xf32>
    %326 = arith.negf %325 : vector<8x128xf32>
    %327 = math.exp %326 : vector<8x128xf32>
    %cst_93 = arith.constant 1.000000e+00 : f32
    %328 = vector.broadcast %cst_93 : f32 to vector<8x128xf32>
    %329 = arith.addf %328, %327 : vector<8x128xf32>
    %330 = arith.divf %328, %329 : vector<8x128xf32>
    %331 = vector.extract_strided_slice %330 {offsets = [0, 0], sizes = [8, 32], strides = [1, 1]} : vector<8x128xf32> to vector<8x32xf32>
    %332 = vector.extract_strided_slice %330 {offsets = [0, 32], sizes = [8, 32], strides = [1, 1]} : vector<8x128xf32> to vector<8x32xf32>
    %333 = vector.extract_strided_slice %330 {offsets = [0, 64], sizes = [8, 32], strides = [1, 1]} : vector<8x128xf32> to vector<8x32xf32>
    %cst_94 = arith.constant 2.000000e+00 : f32
    %334 = vector.broadcast %cst_94 : f32 to vector<8x32xf32>
    %335 = arith.mulf %334, %333 : vector<8x32xf32>
    %cst_95 = arith.constant 1.000000e+00 : f32
    %336 = vector.broadcast %cst_95 : f32 to vector<8x32xf32>
    %337 = arith.subf %335, %336 : vector<8x32xf32>
    %338 = vector.extract_strided_slice %330 {offsets = [0, 96], sizes = [8, 32], strides = [1, 1]} : vector<8x128xf32> to vector<8x32xf32>
    %339 = arith.mulf %332, %297 : vector<8x32xf32>
    %340 = arith.mulf %331, %337 : vector<8x32xf32>
    %341 = arith.addf %339, %340 : vector<8x32xf32>
    %342 = math.tanh %341 : vector<8x32xf32>
    %343 = arith.mulf %338, %342 : vector<8x32xf32>
    %cst_96 = arith.constant dense<0.000000e+00> : vector<8x128xf32>
    %344 = tpu.matmul %343, %11, %cst_96 {dimension_numbers = #tpu.dot_dimension_numbers<[1], [0], [0], [1], [0, 0, 1, 1], [], []>} : vector<8x32xf32>, vector<32x128xf32>, vector<8x128xf32> -> vector<8x128xf32>
    %cst_97 = arith.constant dense<0.000000e+00> : vector<8x128xf32>
    %345 = tpu.matmul %321, %10, %cst_97 {dimension_numbers = #tpu.dot_dimension_numbers<[1], [0], [0], [1], [0, 0, 1, 1], [], []>} : vector<8x32xf32>, vector<32x128xf32>, vector<8x128xf32> -> vector<8x128xf32>
    %346 = arith.addf %344, %345 : vector<8x128xf32>
    %347 = arith.addf %346, %12 : vector<8x128xf32>
    %348 = arith.negf %347 : vector<8x128xf32>
    %349 = math.exp %348 : vector<8x128xf32>
    %cst_98 = arith.constant 1.000000e+00 : f32
    %350 = vector.broadcast %cst_98 : f32 to vector<8x128xf32>
    %351 = arith.addf %350, %349 : vector<8x128xf32>
    %352 = arith.divf %350, %351 : vector<8x128xf32>
    %353 = vector.extract_strided_slice %352 {offsets = [0, 0], sizes = [8, 32], strides = [1, 1]} : vector<8x128xf32> to vector<8x32xf32>
    %354 = vector.extract_strided_slice %352 {offsets = [0, 32], sizes = [8, 32], strides = [1, 1]} : vector<8x128xf32> to vector<8x32xf32>
    %355 = vector.extract_strided_slice %352 {offsets = [0, 64], sizes = [8, 32], strides = [1, 1]} : vector<8x128xf32> to vector<8x32xf32>
    %cst_99 = arith.constant 2.000000e+00 : f32
    %356 = vector.broadcast %cst_99 : f32 to vector<8x32xf32>
    %357 = arith.mulf %356, %355 : vector<8x32xf32>
    %cst_100 = arith.constant 1.000000e+00 : f32
    %358 = vector.broadcast %cst_100 : f32 to vector<8x32xf32>
    %359 = arith.subf %357, %358 : vector<8x32xf32>
    %360 = vector.extract_strided_slice %352 {offsets = [0, 96], sizes = [8, 32], strides = [1, 1]} : vector<8x128xf32> to vector<8x32xf32>
    %361 = arith.mulf %354, %319 : vector<8x32xf32>
    %362 = arith.mulf %353, %359 : vector<8x32xf32>
    %363 = arith.addf %361, %362 : vector<8x32xf32>
    %364 = math.tanh %363 : vector<8x32xf32>
    %365 = arith.mulf %360, %364 : vector<8x32xf32>
    %c128 = arith.constant 128 : index
    %c0_101 = arith.constant 0 : index
    %366 = vector.load %arg1[%c128, %c0_101] : memref<168x128xf32, #tpu.memory_space<vmem>>, vector<32x128xf32>
    %c160 = arith.constant 160 : index
    %c0_102 = arith.constant 0 : index
    %367 = vector.load %arg1[%c160, %c0_102] : memref<168x128xf32, #tpu.memory_space<vmem>>, vector<8x128xf32>
    %cst_103 = arith.constant dense<0.000000e+00> : vector<8x128xf32>
    %368 = tpu.matmul %365, %366, %cst_103 {dimension_numbers = #tpu.dot_dimension_numbers<[1], [0], [0], [1], [0, 0, 1, 1], [], []>} : vector<8x32xf32>, vector<32x128xf32>, vector<8x128xf32> -> vector<8x128xf32>
    %369 = arith.addf %368, %367 : vector<8x128xf32>
    %c0_104 = arith.constant 0 : index
    %c0_105 = arith.constant 0 : index
    %370 = vector.load %arg2[%c0_104, %c0_105] : memref<8x128xf32, #tpu.memory_space<vmem>>, vector<8x128xf32>
    tpu.vector_store %arg2[%c0_104, %c0_105], %369 {strides = array<i32>} : memref<8x128xf32, #tpu.memory_space<vmem>>, vector<8x128xf32>,
    return
  }
}

</mosaic_0001>

<bundles_post_ra>
// kernel: component_model_forward.1
= control target key start
LH: loop header
LB: loop body
LE: loop exit
PB: predicated region body
PF: predicated region fallthrough
CT: control target
= control target key end

     0   :  { %7 = vsyncpa [#allocation4], 0  ;;  %s1562_s12 = smov [#allocation3]   ;;  %s1563_s14 = smov 128   ;;  %s1900_s0 = inlined_call_operand.vmem [shape: f32[64,16], index: 0, kind: input, shape index: {}]   ;;  %s1901_s1 = inlined_call_operand.hbm [shape: f32[168,128], index: 1, kind: input, shape index: {}]   ;;  %s1902_s2 = inlined_call_operand.vmem [shape: f32[8,128], index: 2, kind: output, shape index: {}]  }
   0x1   :  { %s14_s11 = sshll.u32 %s1901_s1, 4  ;;  %s16_s13 = sshll.u32 %s1562_s12, 4  ;;  %s15_s11 = int_to_ptr.hbm [resolvable:$true] %s14_s11  ;;  %s17_s13 = int_to_ptr.vmem [resolvable:$true] %s16_s13 }
   0x2   :  { %s1564_s15 = smov 8  }
   0x3   :  { %22 = dma.hbm_to_vmem [thread:$0]  %s15_s11, 2688, %s17_s13, [#allocation4], %s1563_s14, %s1563_s14, %s1564_s15  }
   0x4   :  { %1560 = dma.done.wait [#allocation4], 2688  }
   0x5   :  { %1561 = vsyncadd [#allocation4], 4294964608  ;;  %v1586_v0 = vld [vmem:[#allocation3 + $0x28] sm:$0xff]  ;;  %v1588_v2 = vld [vmem:[#allocation3 + $0x20] sm:$0xff]  ;;  %vm38_vm0 = vcmask 130048   ;;  %v1565_v7 = vmov 0.0  }
   0x6   :  { %v28_v1 = vld [vmem:[#allocation3 + $0x8] sm:$0xff]  ;;  %150 = vmatpush.msra.mxu1 %v1586_v0  ;;  %v27_v3 = vld [vmem:[#allocation3] sm:$0xff]  ;;  %v1594_v5 = vld [vmem:[#allocation3 + $0x18] sm:$0xff]  ;;  %s1566_s17 = smov 64   ;;  %s1567_s18 = smov 32   ;;  %vm134_vm5 = vcmask 261120  }
   0x7   :  { %77 = vmatpush.msra.mxu0 %v28_v1  ;;  %v30_v4 = vld [vmem:[%s1900_s0] sm:$0xff]  ;;  %v1598_v6 = vld [vmem:[#allocation3 + $0x10] sm:$0xff]  ;;  %v1624_v36 = vld [vmem:[#allocation3 + $0x68] sm:$0xff] }
   0x8   :  { %151 = vmatpush.msra.mxu1 %v1588_v2  ;;  %v1611_v8 = vld [vmem:[#allocation3 + $0x30] sm:$0xff]  ;;  %v1628_v37 = vld [vmem:[#allocation3 + $0x48] sm:$0xff]  ;;  %v1630_v38 = vld [vmem:[#allocation3 + $0x60] sm:$0xff] }
   0x9   :  { %78 = vmatpush.msra.mxu0 %v27_v3  ;;  %v1620_v34 = vld [vmem:[#allocation3 + $0x70] sm:$0xff]  ;;  %v1632_v39 = vld [vmem:[#allocation3 + $0x40] sm:$0xff]  ;;  %v31_v40 = vld [vmem:[%s1900_s0 + $0x8] sm:$0xff] }
   0xa   :  { %1367 = vmatmul.msk.f32.vlgmr.msra.gmra.mxu0 %vm38_vm0, %v30_v4  ;;  %152 = vmatpush.msra.mxu1 %v1594_v5  ;;  %v1622_v35 = vld [vmem:[#allocation3 + $0x50] sm:$0xff]  ;;  %v1640_v41 = vld [vmem:[#allocation3 + $0x58] sm:$0xff] }
   0xb   :  { %209 = vmatpush.msra.mxu2 %v1620_v34  ;;  %234 = vmatpush.msra.mxu3 %v1622_v35  ;;  %v1642_v42 = vld [vmem:[#allocation3 + $0x38] sm:$0xff] }
   0xc   :  { %153 = vmatpush.msra.mxu1 %v1598_v6  ;;  %v1673_v52 = vld [vmem:[#allocation3 + $0x78] sm:$0xff] }
   0xd   :  { %154 = vmatmul.f32.vlgmr.msra.gmra.mxu1 %v1565_v7  ;;  %210 = vmatpush.msra.mxu2 %v1624_v36 }
   0xe   :  { %295 = vmatpush.msrb.mxu1 %v1586_v0  ;;  %235 = vmatpush.msra.mxu3 %v1628_v37 }
   0xf   :  { %211 = vmatpush.msra.mxu2 %v1630_v38 }
  0x10   :  { %296 = vmatpush.msrb.mxu1 %v1588_v2  ;;  %236 = vmatpush.msra.mxu3 %v1632_v39 }
  0x11   :  { %212 = vmatpush.msra.mxu2 %v1640_v41 }
  0x12   :  { %297 = vmatpush.msrb.mxu1 %v1594_v5  ;;  %1368 = vmatmul.msk.f32.gmra.mxu0 %vm38_vm0, %v31_v40 }
  0x13   :  { %237 = vmatpush.msra.mxu3 %v1642_v42  ;;  %213 = vmatmul.f32.vlgmr.msra.gmra.mxu2 %v1565_v7 }
  0x14   :  { %298 = vmatpush.msrb.mxu1 %v1598_v6  ;;  %359 = vmatpush.msrb.mxu2 %v1620_v34 }
  0x15   :  { %384 = vmatpush.msrb.mxu3 %v1622_v35 }
  0x16   :  { %445 = vmatpush.msra.mxu1 %v1586_v0  ;;  %360 = vmatpush.msrb.mxu2 %v1624_v36 }
  0x17   :  { %385 = vmatpush.msrb.mxu3 %v1628_v37 }
  0x18   :  { %446 = vmatpush.msra.mxu1 %v1588_v2  ;;  %361 = vmatpush.msrb.mxu2 %v1630_v38 }
  0x19   :  { %386 = vmatpush.msrb.mxu3 %v1632_v39 }
  0x1a   :  { %447 = vmatpush.msra.mxu1 %v1594_v5  ;;  %362 = vmatpush.msrb.mxu2 %v1640_v41 }
  0x1b   :  { %387 = vmatpush.msrb.mxu3 %v1642_v42 }
  0x1c   :  { %448 = vmatpush.msra.mxu1 %v1598_v6  ;;  %509 = vmatpush.msra.mxu2 %v1620_v34 }
  0x1e   :  { %510 = vmatpush.msra.mxu2 %v1624_v36 }
  0x20   :  { %511 = vmatpush.msra.mxu2 %v1630_v38 }
  0x22   :  { %512 = vmatpush.msra.mxu2 %v1640_v41 }
  0x87   :  { %v80_v9 = vpop.f32.mrf.mxu0 }
  0x88   :  { %v104_v10 = vadd.f32 %v80_v9, %v1611_v8 }
  0x8a   :  { %v155_v11 = vpop.f32.mrf.mxu1 }
  0x8b   :  { %v158_v12 = vadd.f32 %v155_v11, %v104_v10 }
  0x8d   :  { %v1375_v13 = vmul.f32 -1.442695, %v158_v12 }
  0x8f   :  { %1436 = vpow2.f32 %v1375_v13  ;;  %v83_v46 = vpop.f32.mrf.mxu0 }
  0x90   :  { %v105_v47 = vadd.f32 %v83_v46, %v1611_v8 }
  0x95   :  { %v1437_v14 = vpop.eup %1436 }
  0x96   :  { %v162_v15 = vadd.f32 1.0, %v1437_v14  ;;  %v214_v51 = vpop.f32.mrf.mxu2 }
  0x98   :  { %1438 = vrcp.f32 %v162_v15  ;;  %v174_v19 = vand.u32 2147483648, %v162_v15  ;;  %v172_v21 = vand.u32 2147483647, %v162_v15  ;;  %vm168_vm2 = vweird.f32 %v162_v15 }
  0x9a   :  { %v175_v23 = vor.u32 1.1754944e-38, %v174_v19  ;;  %vm173_vm4 = vcmp.eq.f32.partialorder %v172_v21, 8.507059e+37 }
  0x9e   :  { %v1439_v16 = vpop.eup %1438 }
  0x9f   :  { %v164_v17 = vmul.f32 %v1439_v16, %v162_v15  ;;  %vm169_vm1 = vweird.f32 %v1439_v16 }
  0xa0   :  { %vm170_vm3 = vmor %vm168_vm2, %vm169_vm1 }
  0xa1   :  { %v165_v18 = vsub.f32 1.0, %v164_v17 }
  0xa3   :  { %v166_v20 = vmul.f32 %v1439_v16, %v165_v18 }
  0xa5   :  { %v167_v22 = vadd.f32 %v1439_v16, %v166_v20 }
  0xa7   :  { %v171_v24 = vsel %vm170_vm3, %v1439_v16, %v167_v22 }
  0xa8   :  { %v176_v25 = vsel %vm173_vm4, %v175_v23, %v171_v24 }
  0xa9   :  { %v178_v26 = vmul.f32 2.0, %v176_v25  ;;  %v180_v30 = vmul.f32 0.0, %v176_v25 }
  0xab   :  { %v1376_v27 = vadd.f32 -1.0, %v178_v26 }
  0xad   :  { %182 = vrot.lane.b32.xlu0 %v1376_v27, %s1566_s17 }
 0x11f   :  { %v183_v28 = vpop.permute.xlu0 %182 }
 0x120   :  { %v185_v29 = vmul.f32 %v183_v28, %v176_v25 }
 0x122   :  { %187 = vrot.lane.b32.xlu0 %v185_v29, %s1567_s18 }
 0x194   :  { %v188_v31 = vpop.permute.xlu0 %187 }
 0x195   :  { %v1616_v32 = vadd.f32 %v188_v31, %v180_v30 }
 0x197   :  { %1440 = vtanh.f32 %v1616_v32 }
 0x19d   :  { %v1441_v33 = vpop.eup %1440 }
 0x19e   :  { %193 = vrot.lane.b32.xlu1 %v1441_v33, %s1566_s17 }
 0x210   :  { %v194_v43 = vpop.permute.xlu1 %193 }
 0x211   :  { %v196_v44 = vmul.f32 %v194_v43, %v176_v25 }
 0x213   :  { %218 = vrot.lane.b32.xlu1 %v196_v44, %s1567_s18 }
 0x285   :  { %v219_v45 = vpop.permute.xlu1 %218 }
 0x286   :  { %1377 = vmatmul.msk.f32.vlgmr.msra.gmra.mxu3 %vm134_vm5, %v219_v45  ;;  %1380 = vmatmul.msk.f32.vlgmr.msrb.gmra.mxu1 %vm134_vm5, %v219_v45 }
 0x287   :  { %595 = vmatpush.msrb.mxu1 %v1586_v0  ;;  %534 = vmatpush.msra.mxu3 %v1622_v35 }
 0x289   :  { %596 = vmatpush.msrb.mxu1 %v1588_v2  ;;  %535 = vmatpush.msra.mxu3 %v1628_v37 }
 0x28b   :  { %597 = vmatpush.msrb.mxu1 %v1594_v5  ;;  %536 = vmatpush.msra.mxu3 %v1632_v39 }
 0x28d   :  { %598 = vmatpush.msrb.mxu1 %v1598_v6  ;;  %537 = vmatpush.msra.mxu3 %v1642_v42 }
 0x303   :  { %v300_v48 = vpop.f32.mrf.mxu1 }
 0x304   :  { %v303_v49 = vadd.f32 %v300_v48, %v105_v47 }
 0x306   :  { %v1381_v50 = vmul.f32 -1.442695, %v303_v49 }
 0x308   :  { %1442 = vpow2.f32 %v1381_v50 }
 0x309   :  { %v239_v53 = vpop.f32.mrf.mxu3 }
 0x30a   :  { %v240_v54 = vadd.f32 %v239_v53, %v214_v51 }
 0x30c   :  { %v242_v55 = vadd.f32 %v240_v54, %v1673_v52 }
 0x30e   :  { %v1443_v56 = vpop.eup %1442  ;;  %v1378_v57 = vmul.f32 -1.442695, %v242_v55 }
 0x30f   :  { %v307_v58 = vadd.f32 1.0, %v1443_v56 }
 0x310   :  { %1444 = vpow2.f32 %v1378_v57 }
 0x311   :  { %1446 = vrcp.f32 %v307_v58  ;;  %v319_v15 = vand.u32 2147483648, %v307_v58  ;;  %vm313_vm11 = vweird.f32 %v307_v58  ;;  %v317_v17 = vand.u32 2147483647, %v307_v58 }
 0x313   :  { %v320_v21 = vor.u32 1.1754944e-38, %v319_v15  ;;  %vm318_vm13 = vcmp.eq.f32.partialorder %v317_v17, 8.507059e+37 }
 0x316   :  { %v1445_v59 = vpop.eup %1444 }
 0x317   :  { %v1447_v60 = vpop.eup %1446  ;;  %v246_v61 = vadd.f32 1.0, %v1445_v59 }
 0x318   :  { %v309_v62 = vmul.f32 %v1447_v60, %v307_v58  ;;  %vm314_vm8 = vweird.f32 %v1447_v60 }
 0x319   :  { %1448 = vrcp.f32 %v246_v61  ;;  %v258_v9 = vand.u32 2147483648, %v246_v61  ;;  %v256_v11 = vand.u32 2147483647, %v246_v61  ;;  %vm252_vm7 = vweird.f32 %v246_v61  ;;  %vm315_vm12 = vmor %vm313_vm11, %vm314_vm8 }
 0x31a   :  { %v310_v63 = vsub.f32 1.0, %v309_v62 }
 0x31b   :  { %v259_v14 = vor.u32 1.1754944e-38, %v258_v9  ;;  %vm257_vm10 = vcmp.eq.f32.partialorder %v256_v11, 8.507059e+37 }
 0x31c   :  { %v311_v7 = vmul.f32 %v1447_v60, %v310_v63 }
 0x31e   :  { %v312_v13 = vadd.f32 %v1447_v60, %v311_v7 }
 0x31f   :  { %v1449_v1 = vpop.eup %1448 }
 0x320   :  { %v248_v3 = vmul.f32 %v1449_v1, %v246_v61  ;;  %vm253_vm6 = vweird.f32 %v1449_v1  ;;  %v316_v20 = vsel %vm315_vm12, %v1447_v60, %v312_v13 }
 0x321   :  { %vm254_vm9 = vmor %vm252_vm7, %vm253_vm6  ;;  %v321_v23 = vsel %vm318_vm13, %v320_v21, %v316_v20 }
 0x322   :  { %v249_v4 = vsub.f32 1.0, %v248_v3  ;;  %v323_v24 = vmul.f32 2.0, %v321_v23  ;;  %v325_v40 = vmul.f32 %v321_v23, %v1616_v32  ;;  %v32_v32 = vld [vmem:[%s1900_s0 + $0x10] sm:$0xff] }
 0x323   :  { %1369 = vmatmul.msk.f32.gmra.mxu0 %vm38_vm0, %v32_v32 }
 0x324   :  { %v250_v10 = vmul.f32 %v1449_v1, %v249_v4  ;;  %v1382_v25 = vadd.f32 -1.0, %v323_v24 }
 0x326   :  { %v251_v12 = vadd.f32 %v1449_v1, %v250_v10 }
 0x328   :  { %v255_v16 = vsel %vm254_vm9, %v1449_v1, %v251_v12 }
 0x329   :  { %v260_v18 = vsel %vm257_vm10, %v259_v14, %v255_v16 }
 0x32a   :  { %v262_v19 = vmul.f32 2.0, %v260_v18  ;;  %v264_v30 = vmul.f32 0.0, %v260_v18 }
 0x32c   :  { %v1379_v22 = vadd.f32 -1.0, %v262_v19 }
 0x32e   :  { %266 = vrot.lane.b32.xlu2 %v1379_v22, %s1566_s17 }
 0x336   :  { %327 = vrot.lane.b32.xlu2 %v1382_v25, %s1566_s17 }
 0x388   :  { %v267_v26 = vpop.permute.xlu2 %266 }
 0x389   :  { %v269_v27 = vmul.f32 %v267_v26, %v260_v18 }
 0x38b   :  { %271 = vrot.lane.b32.xlu0 %v269_v27, %s1567_s18 }
 0x390   :  { %v328_v28 = vpop.permute.xlu2 %327 }
 0x391   :  { %v330_v29 = vmul.f32 %v328_v28, %v321_v23 }
 0x393   :  { %332 = vrot.lane.b32.xlu1 %v330_v29, %s1567_s18 }
 0x3a0   :  { %v86_v54 = vpop.f32.mrf.mxu0 }
 0x3a1   :  { %v106_v55 = vadd.f32 %v86_v54, %v1611_v8 }
 0x3fd   :  { %v272_v31 = vpop.permute.xlu0 %271 }
 0x3fe   :  { %v1680_v33 = vadd.f32 %v272_v31, %v264_v30 }
 0x400   :  { %1450 = vtanh.f32 %v1680_v33 }
 0x405   :  { %v333_v43 = vpop.permute.xlu1 %332 }
 0x406   :  { %v1451_v44 = vpop.eup %1450  ;;  %v1684_v45 = vadd.f32 %v333_v43, %v325_v40 }
 0x407   :  { %277 = vrot.lane.b32.xlu2 %v1451_v44, %s1566_s17 }
 0x408   :  { %1452 = vtanh.f32 %v1684_v45 }
 0x40e   :  { %v1453_v46 = vpop.eup %1452 }
 0x40f   :  { %338 = vrot.lane.b32.xlu0 %v1453_v46, %s1566_s17 }
 0x461   :  { %v278_v47 = vpop.permute.xlu2 %277 }
 0x462   :  { %v280_v48 = vmul.f32 %v278_v47, %v260_v18 }
 0x464   :  { %343 = vrot.lane.b32.xlu1 %v280_v48, %s1567_s18 }
 0x481   :  { %v339_v49 = vpop.permute.xlu0 %338 }
 0x482   :  { %v341_v50 = vmul.f32 %v339_v49, %v321_v23 }
 0x484   :  { %368 = vrot.lane.b32.xlu2 %v341_v50, %s1567_s18 }
 0x4d6   :  { %v344_v51 = vpop.permute.xlu1 %343 }
 0x4d7   :  { %1383 = vmatmul.msk.f32.vlgmr.msrb.gmra.mxu2 %vm134_vm5, %v344_v51 }
 0x4d8   :  { %659 = vmatpush.msrb.mxu2 %v1620_v34 }
 0x4da   :  { %660 = vmatpush.msrb.mxu2 %v1624_v36 }
 0x4dc   :  { %661 = vmatpush.msrb.mxu2 %v1630_v38 }
 0x4de   :  { %v369_v53 = vpop.permute.xlu2 %368  ;;  %662 = vmatpush.msrb.mxu2 %v1640_v41 }
 0x4df   :  { %1384 = vmatmul.msk.f32.vlgmr.msrb.gmra.mxu3 %vm134_vm5, %v369_v53  ;;  %1387 = vmatmul.msk.f32.vlgmr.msra.gmra.mxu1 %vm134_vm5, %v369_v53 }
 0x4e0   :  { %684 = vmatpush.msrb.mxu3 %v1622_v35  ;;  %745 = vmatpush.msra.mxu1 %v1586_v0 }
 0x4e2   :  { %685 = vmatpush.msrb.mxu3 %v1628_v37  ;;  %746 = vmatpush.msra.mxu1 %v1588_v2 }
 0x4e4   :  { %686 = vmatpush.msrb.mxu3 %v1632_v39  ;;  %747 = vmatpush.msra.mxu1 %v1594_v5 }
 0x4e6   :  { %687 = vmatpush.msrb.mxu3 %v1642_v42  ;;  %748 = vmatpush.msra.mxu1 %v1598_v6 }
 0x55a   :  { %v364_v59 = vpop.f32.mrf.mxu2 }
 0x55c   :  { %v450_v56 = vpop.f32.mrf.mxu1 }
 0x55d   :  { %v453_v57 = vadd.f32 %v450_v56, %v106_v55 }
 0x55f   :  { %v1388_v58 = vmul.f32 -1.442695, %v453_v57 }
 0x561   :  { %1454 = vpow2.f32 %v1388_v58 }
 0x562   :  { %v389_v60 = vpop.f32.mrf.mxu3 }
 0x563   :  { %v390_v61 = vadd.f32 %v389_v60, %v364_v59 }
 0x565   :  { %v392_v62 = vadd.f32 %v390_v61, %v1673_v52 }
 0x567   :  { %v1455_v63 = vpop.eup %1454  ;;  %v1385_v1 = vmul.f32 -1.442695, %v392_v62 }
 0x568   :  { %v457_v3 = vadd.f32 1.0, %v1455_v63 }
 0x569   :  { %1456 = vpow2.f32 %v1385_v1 }
 0x56a   :  { %1458 = vrcp.f32 %v457_v3  ;;  %v469_v12 = vand.u32 2147483648, %v457_v3  ;;  %v467_v14 = vand.u32 2147483647, %v457_v3  ;;  %vm463_vm15 = vweird.f32 %v457_v3 }
 0x56c   :  { %v470_v17 = vor.u32 1.1754944e-38, %v469_v12  ;;  %vm468_vm2 = vcmp.eq.f32.partialorder %v467_v14, 8.507059e+37 }
 0x56f   :  { %v1457_v4 = vpop.eup %1456 }
 0x570   :  { %v1459_v7 = vpop.eup %1458  ;;  %v396_v9 = vadd.f32 1.0, %v1457_v4 }
 0x571   :  { %v459_v10 = vmul.f32 %v1459_v7, %v457_v3  ;;  %vm464_vm14 = vweird.f32 %v1459_v7 }
 0x572   :  { %1460 = vrcp.f32 %v396_v9  ;;  %vm465_vm1 = vmor %vm463_vm15, %vm464_vm14  ;;  %v408_v23 = vand.u32 2147483648, %v396_v9  ;;  %v406_v26 = vand.u32 2147483647, %v396_v9  ;;  %vm402_vm4 = vweird.f32 %v396_v9 }
 0x573   :  { %v460_v11 = vsub.f32 1.0, %v459_v10 }
 0x574   :  { %v409_v28 = vor.u32 1.1754944e-38, %v408_v23  ;;  %vm407_vm7 = vcmp.eq.f32.partialorder %v406_v26, 8.507059e+37 }
 0x575   :  { %v461_v13 = vmul.f32 %v1459_v7, %v460_v11 }
 0x577   :  { %v462_v15 = vadd.f32 %v1459_v7, %v461_v13 }
 0x578   :  { %v1461_v16 = vpop.eup %1460 }
 0x579   :  { %v398_v18 = vmul.f32 %v1461_v16, %v396_v9  ;;  %v466_v19 = vsel %vm465_vm1, %v1459_v7, %v462_v15  ;;  %vm403_vm3 = vweird.f32 %v1461_v16 }
 0x57a   :  { %v471_v20 = vsel %vm468_vm2, %v470_v17, %v466_v19  ;;  %vm404_vm6 = vmor %vm402_vm4, %vm403_vm3 }
 0x57b   :  { %v399_v21 = vsub.f32 1.0, %v398_v18  ;;  %v473_v22 = vmul.f32 2.0, %v471_v20  ;;  %v475_v51 = vmul.f32 %v471_v20, %v1684_v45 }
 0x57d   :  { %v1389_v24 = vadd.f32 -1.0, %v473_v22  ;;  %v400_v25 = vmul.f32 %v1461_v16, %v399_v21 }
 0x57f   :  { %477 = vrot.lane.b32.xlu1 %v1389_v24, %s1566_s17  ;;  %v401_v27 = vadd.f32 %v1461_v16, %v400_v25 }
 0x581   :  { %v405_v29 = vsel %vm404_vm6, %v1461_v16, %v401_v27 }
 0x582   :  { %v410_v30 = vsel %vm407_vm7, %v409_v28, %v405_v29 }
 0x583   :  { %v412_v31 = vmul.f32 2.0, %v410_v30  ;;  %v414_v48 = vmul.f32 %v410_v30, %v1680_v33  ;;  %v33_v33 = vld [vmem:[%s1900_s0 + $0x18] sm:$0xff] }
 0x584   :  { %1370 = vmatmul.msk.f32.gmra.mxu0 %vm38_vm0, %v33_v33 }
 0x585   :  { %v1386_v40 = vadd.f32 -1.0, %v412_v31 }
 0x587   :  { %416 = vrot.lane.b32.xlu0 %v1386_v40, %s1566_s17 }
 0x5f1   :  { %v478_v43 = vpop.permute.xlu1 %477 }
 0x5f2   :  { %v480_v44 = vmul.f32 %v478_v43, %v471_v20 }
 0x5f4   :  { %482 = vrot.lane.b32.xlu0 %v480_v44, %s1567_s18 }
 0x5f9   :  { %v417_v46 = vpop.permute.xlu0 %416 }
 0x5fa   :  { %v419_v47 = vmul.f32 %v417_v46, %v410_v30 }
 0x5fc   :  { %421 = vrot.lane.b32.xlu2 %v419_v47, %s1567_s18 }
 0x601   :  { %v89_v61 = vpop.f32.mrf.mxu0 }
 0x602   :  { %v107_v62 = vadd.f32 %v89_v61, %v1611_v8 }
 0x656   :  { %v422_v49 = vpop.permute.xlu2 %421 }
 0x657   :  { %v1717_v50 = vadd.f32 %v422_v49, %v414_v48 }
 0x659   :  { %1462 = vtanh.f32 %v1717_v50 }
 0x65f   :  { %v1463_v32 = vpop.eup %1462 }
 0x660   :  { %427 = vrot.lane.b32.xlu1 %v1463_v32, %s1566_s17 }
 0x666   :  { %v483_v53 = vpop.permute.xlu0 %482 }
 0x667   :  { %v1722_v54 = vadd.f32 %v483_v53, %v475_v51 }
 0x669   :  { %1464 = vtanh.f32 %v1722_v54 }
 0x66f   :  { %v1465_v55 = vpop.eup %1464 }
 0x670   :  { %488 = vrot.lane.b32.xlu2 %v1465_v55, %s1566_s17 }
 0x6ca   :  { %v489_v56 = vpop.permute.xlu2 %488 }
 0x6cb   :  { %v491_v57 = vmul.f32 %v489_v56, %v471_v20 }
 0x6cd   :  { %518 = vrot.lane.b32.xlu1 %v491_v57, %s1567_s18 }
 0x6d2   :  { %v428_v58 = vpop.permute.xlu1 %427 }
 0x6d3   :  { %v430_v45 = vmul.f32 %v428_v58, %v410_v30 }
 0x6d5   :  { %493 = vrot.lane.b32.xlu0 %v430_v45, %s1567_s18 }
 0x73f   :  { %v519_v59 = vpop.permute.xlu1 %518 }
 0x740   :  { %1391 = vmatmul.msk.f32.vlgmr.msra.gmra.mxu3 %vm134_vm5, %v519_v59  ;;  %1394 = vmatmul.msk.f32.vlgmr.msrb.gmra.mxu1 %vm134_vm5, %v519_v59 }
 0x741   :  { %834 = vmatpush.msra.mxu3 %v1622_v35  ;;  %895 = vmatpush.msrb.mxu1 %v1586_v0 }
 0x743   :  { %835 = vmatpush.msra.mxu3 %v1628_v37  ;;  %896 = vmatpush.msrb.mxu1 %v1588_v2 }
 0x745   :  { %836 = vmatpush.msra.mxu3 %v1632_v39  ;;  %897 = vmatpush.msrb.mxu1 %v1594_v5 }
 0x747   :  { %v494_v60 = vpop.permute.xlu0 %493  ;;  %837 = vmatpush.msra.mxu3 %v1642_v42  ;;  %898 = vmatpush.msrb.mxu1 %v1598_v6 }
 0x748   :  { %1390 = vmatmul.msk.f32.vlgmr.msra.gmra.mxu2 %vm134_vm5, %v494_v60 }
 0x749   :  { %809 = vmatpush.msra.mxu2 %v1620_v34 }
 0x74b   :  { %810 = vmatpush.msra.mxu2 %v1624_v36 }
 0x74d   :  { %811 = vmatpush.msra.mxu2 %v1630_v38 }
 0x74f   :  { %812 = vmatpush.msra.mxu2 %v1640_v41 }
 0x7bd   :  { %v600_v63 = vpop.f32.mrf.mxu1 }
 0x7be   :  { %v603_v1 = vadd.f32 %v600_v63, %v107_v62 }
 0x7c0   :  { %v1395_v3 = vmul.f32 -1.442695, %v603_v1 }
 0x7c2   :  { %1466 = vpow2.f32 %v1395_v3 }
 0x7c3   :  { %v539_v9 = vpop.f32.mrf.mxu3 }
 0x7c8   :  { %v1467_v4 = vpop.eup %1466 }
 0x7c9   :  { %v607_v7 = vadd.f32 1.0, %v1467_v4 }
 0x7cb   :  { %1468 = vrcp.f32 %v607_v7  ;;  %v514_v10 = vpop.f32.mrf.mxu2  ;;  %v619_v17 = vand.u32 2147483648, %v607_v7  ;;  %v617_v19 = vand.u32 2147483647, %v607_v7  ;;  %vm613_vm9 = vweird.f32 %v607_v7 }
 0x7cc   :  { %v540_v11 = vadd.f32 %v539_v9, %v514_v10 }
 0x7cd   :  { %v620_v23 = vor.u32 1.1754944e-38, %v619_v17  ;;  %vm618_vm11 = vcmp.eq.f32.partialorder %v617_v19, 8.507059e+37 }
 0x7ce   :  { %v542_v12 = vadd.f32 %v540_v11, %v1673_v52 }
 0x7d0   :  { %v1392_v13 = vmul.f32 -1.442695, %v542_v12 }
 0x7d1   :  { %v1469_v14 = vpop.eup %1468 }
 0x7d2   :  { %v609_v15 = vmul.f32 %v1469_v14, %v607_v7  ;;  %1470 = vpow2.f32 %v1392_v13  ;;  %vm614_vm8 = vweird.f32 %v1469_v14 }
 0x7d3   :  { %vm615_vm10 = vmor %vm613_vm9, %vm614_vm8 }
 0x7d4   :  { %v610_v16 = vsub.f32 1.0, %v609_v15 }
 0x7d6   :  { %v611_v18 = vmul.f32 %v1469_v14, %v610_v16 }
 0x7d8   :  { %v1471_v20 = vpop.eup %1470  ;;  %v612_v21 = vadd.f32 %v1469_v14, %v611_v18 }
 0x7d9   :  { %v546_v22 = vadd.f32 1.0, %v1471_v20 }
 0x7da   :  { %v616_v24 = vsel %vm615_vm10, %v1469_v14, %v612_v21 }
 0x7db   :  { %1472 = vrcp.f32 %v546_v22  ;;  %v621_v25 = vsel %vm618_vm11, %v620_v23, %v616_v24  ;;  %v558_v31 = vand.u32 2147483648, %v546_v22  ;;  %v556_v43 = vand.u32 2147483647, %v546_v22 }
 0x7dc   :  { %v623_v26 = vmul.f32 2.0, %v621_v25  ;;  %vm552_vm13 = vweird.f32 %v546_v22  ;;  %v625_v56 = vmul.f32 %v621_v25, %v1722_v54 }
 0x7dd   :  { %v559_v46 = vor.u32 1.1754944e-38, %v558_v31  ;;  %vm557_vm15 = vcmp.eq.f32.partialorder %v556_v43, 8.507059e+37 }
 0x7de   :  { %v1396_v27 = vadd.f32 -1.0, %v623_v26 }
 0x7e0   :  { %627 = vrot.lane.b32.xlu0 %v1396_v27, %s1566_s17 }
 0x7e1   :  { %v1473_v28 = vpop.eup %1472 }
 0x7e2   :  { %v548_v29 = vmul.f32 %v1473_v28, %v546_v22  ;;  %vm553_vm12 = vweird.f32 %v1473_v28 }
 0x7e3   :  { %vm554_vm14 = vmor %vm552_vm13, %vm553_vm12 }
 0x7e4   :  { %v549_v30 = vsub.f32 1.0, %v548_v29 }
 0x7e6   :  { %v550_v40 = vmul.f32 %v1473_v28, %v549_v30 }
 0x7e8   :  { %v551_v44 = vadd.f32 %v1473_v28, %v550_v40 }
 0x7ea   :  { %v555_v47 = vsel %vm554_vm14, %v1473_v28, %v551_v44 }
 0x7eb   :  { %v560_v48 = vsel %vm557_vm15, %v559_v46, %v555_v47 }
 0x7ec   :  { %v562_v49 = vmul.f32 2.0, %v560_v48  ;;  %v564_v59 = vmul.f32 %v560_v48, %v1717_v50  ;;  %v34_v50 = vld [vmem:[%s1900_s0 + $0x20] sm:$0xff] }
 0x7ed   :  { %1371 = vmatmul.msk.f32.gmra.mxu0 %vm38_vm0, %v34_v50 }
 0x7ee   :  { %v1393_v32 = vadd.f32 -1.0, %v562_v49 }
 0x7f0   :  { %566 = vrot.lane.b32.xlu2 %v1393_v32, %s1566_s17 }
 0x84a   :  { %v567_v51 = vpop.permute.xlu2 %566 }
 0x84b   :  { %v569_v53 = vmul.f32 %v567_v51, %v560_v48 }
 0x84d   :  { %571 = vrot.lane.b32.xlu1 %v569_v53, %s1567_s18 }
 0x852   :  { %v628_v55 = vpop.permute.xlu0 %627 }
 0x853   :  { %v630_v33 = vmul.f32 %v628_v55, %v621_v25 }
 0x855   :  { %632 = vrot.lane.b32.xlu2 %v630_v33, %s1567_s18 }
 0x86a   :  { %v92_v9 = vpop.f32.mrf.mxu0 }
 0x86b   :  { %v108_v10 = vadd.f32 %v92_v9, %v1611_v8 }
 0x8af   :  { %v633_v57 = vpop.permute.xlu2 %632 }
 0x8b0   :  { %v1754_v58 = vadd.f32 %v633_v57, %v625_v56 }
 0x8b2   :  { %1474 = vtanh.f32 %v1754_v58 }
 0x8b8   :  { %v1475_v45 = vpop.eup %1474 }
 0x8b9   :  { %638 = vrot.lane.b32.xlu1 %v1475_v45, %s1566_s17 }
 0x8bf   :  { %v572_v60 = vpop.permute.xlu1 %571 }
 0x8c0   :  { %v1759_v61 = vadd.f32 %v572_v60, %v564_v59 }
 0x8c2   :  { %1476 = vtanh.f32 %v1759_v61 }
 0x8c8   :  { %v1477_v62 = vpop.eup %1476 }
 0x8c9   :  { %577 = vrot.lane.b32.xlu0 %v1477_v62, %s1566_s17 }
 0x92b   :  { %v639_v63 = vpop.permute.xlu1 %638 }
 0x92c   :  { %v641_v54 = vmul.f32 %v639_v63, %v621_v25 }
 0x92e   :  { %668 = vrot.lane.b32.xlu0 %v641_v54, %s1567_s18 }
 0x93b   :  { %v578_v1 = vpop.permute.xlu0 %577 }
 0x93c   :  { %v580_v3 = vmul.f32 %v578_v1, %v560_v48 }
 0x93e   :  { %643 = vrot.lane.b32.xlu2 %v580_v3, %s1567_s18 }
 0x998   :  { %v644_v4 = vpop.permute.xlu2 %643 }
 0x999   :  { %1397 = vmatmul.msk.f32.vlgmr.msrb.gmra.mxu2 %vm134_vm5, %v644_v4 }
 0x99a   :  { %959 = vmatpush.msrb.mxu2 %v1620_v34 }
 0x99c   :  { %960 = vmatpush.msrb.mxu2 %v1624_v36 }
 0x99e   :  { %961 = vmatpush.msrb.mxu2 %v1630_v38 }
 0x9a0   :  { %v669_v7 = vpop.permute.xlu0 %668  ;;  %962 = vmatpush.msrb.mxu2 %v1640_v41 }
 0x9a1   :  { %1398 = vmatmul.msk.f32.vlgmr.msrb.gmra.mxu3 %vm134_vm5, %v669_v7  ;;  %1401 = vmatmul.msk.f32.vlgmr.msra.gmra.mxu1 %vm134_vm5, %v669_v7 }
 0x9a2   :  { %984 = vmatpush.msrb.mxu3 %v1622_v35  ;;  %1045 = vmatpush.msra.mxu1 %v1586_v0 }
 0x9a4   :  { %985 = vmatpush.msrb.mxu3 %v1628_v37  ;;  %1046 = vmatpush.msra.mxu1 %v1588_v2 }
 0x9a6   :  { %986 = vmatpush.msrb.mxu3 %v1632_v39  ;;  %1047 = vmatpush.msra.mxu1 %v1594_v5 }
 0x9a8   :  { %987 = vmatpush.msrb.mxu3 %v1642_v42  ;;  %1048 = vmatpush.msra.mxu1 %v1598_v6 }
 0xa1c   :  { %v664_v14 = vpop.f32.mrf.mxu2 }
 0xa1e   :  { %v750_v11 = vpop.f32.mrf.mxu1 }
 0xa1f   :  { %v753_v12 = vadd.f32 %v750_v11, %v108_v10 }
 0xa21   :  { %v1402_v13 = vmul.f32 -1.442695, %v753_v12 }
 0xa23   :  { %1478 = vpow2.f32 %v1402_v13 }
 0xa24   :  { %v689_v15 = vpop.f32.mrf.mxu3 }
 0xa25   :  { %v690_v16 = vadd.f32 %v689_v15, %v664_v14 }
 0xa27   :  { %v692_v17 = vadd.f32 %v690_v16, %v1673_v52 }
 0xa29   :  { %v1479_v18 = vpop.eup %1478  ;;  %v1399_v19 = vmul.f32 -1.442695, %v692_v17 }
 0xa2a   :  { %v757_v20 = vadd.f32 1.0, %v1479_v18 }
 0xa2b   :  { %1480 = vpow2.f32 %v1399_v19 }
 0xa2c   :  { %1482 = vrcp.f32 %v757_v20  ;;  %v769_v26 = vand.u32 2147483648, %v757_v20  ;;  %v767_v28 = vand.u32 2147483647, %v757_v20  ;;  %vm763_vm2 = vweird.f32 %v757_v20 }
 0xa2e   :  { %v770_v31 = vor.u32 1.1754944e-38, %v769_v26  ;;  %vm768_vm4 = vcmp.eq.f32.partialorder %v767_v28, 8.507059e+37 }
 0xa31   :  { %v1481_v21 = vpop.eup %1480 }
 0xa32   :  { %v1483_v22 = vpop.eup %1482  ;;  %v696_v23 = vadd.f32 1.0, %v1481_v21 }
 0xa33   :  { %v759_v24 = vmul.f32 %v1483_v22, %v757_v20  ;;  %vm764_vm1 = vweird.f32 %v1483_v22 }
 0xa34   :  { %1484 = vrcp.f32 %v696_v23  ;;  %vm765_vm3 = vmor %vm763_vm2, %vm764_vm1  ;;  %v708_v48 = vand.u32 2147483648, %v696_v23  ;;  %v706_v51 = vand.u32 2147483647, %v696_v23  ;;  %vm702_vm7 = vweird.f32 %v696_v23 }
 0xa35   :  { %v760_v25 = vsub.f32 1.0, %v759_v24 }
 0xa36   :  { %v709_v55 = vor.u32 1.1754944e-38, %v708_v48  ;;  %vm707_vm9 = vcmp.eq.f32.partialorder %v706_v51, 8.507059e+37 }
 0xa37   :  { %v761_v27 = vmul.f32 %v1483_v22, %v760_v25 }
 0xa39   :  { %v762_v29 = vadd.f32 %v1483_v22, %v761_v27 }
 0xa3a   :  { %v1485_v30 = vpop.eup %1484 }
 0xa3b   :  { %v698_v40 = vmul.f32 %v1485_v30, %v696_v23  ;;  %v766_v43 = vsel %vm765_vm3, %v1483_v22, %v762_v29  ;;  %vm703_vm6 = vweird.f32 %v1485_v30 }
 0xa3c   :  { %v771_v44 = vsel %vm768_vm4, %v770_v31, %v766_v43  ;;  %vm704_vm8 = vmor %vm702_vm7, %vm703_vm6 }
 0xa3d   :  { %v699_v46 = vsub.f32 1.0, %v698_v40  ;;  %v773_v47 = vmul.f32 2.0, %v771_v44  ;;  %v775_v54 = vmul.f32 %v771_v44, %v1754_v58  ;;  %v35_v58 = vld [vmem:[%s1900_s0 + $0x28] sm:$0xff] }
 0xa3e   :  { %1372 = vmatmul.msk.f32.gmra.mxu0 %vm38_vm0, %v35_v58 }
 0xa3f   :  { %v1403_v49 = vadd.f32 -1.0, %v773_v47  ;;  %v700_v32 = vmul.f32 %v1485_v30, %v699_v46 }
 0xa41   :  { %777 = vrot.lane.b32.xlu2 %v1403_v49, %s1566_s17  ;;  %v701_v53 = vadd.f32 %v1485_v30, %v700_v32 }
 0xa43   :  { %v705_v33 = vsel %vm704_vm8, %v1485_v30, %v701_v53 }
 0xa44   :  { %v710_v56 = vsel %vm707_vm9, %v709_v55, %v705_v33 }
 0xa45   :  { %v712_v57 = vmul.f32 2.0, %v710_v56  ;;  %v714_v4 = vmul.f32 %v710_v56, %v1759_v61 }
 0xa47   :  { %v1400_v45 = vadd.f32 -1.0, %v712_v57 }
 0xa49   :  { %716 = vrot.lane.b32.xlu1 %v1400_v45, %s1566_s17 }
 0xa9b   :  { %v778_v59 = vpop.permute.xlu2 %777 }
 0xa9c   :  { %v780_v60 = vmul.f32 %v778_v59, %v771_v44 }
 0xa9e   :  { %782 = vrot.lane.b32.xlu1 %v780_v60, %s1567_s18 }
 0xabb   :  { %v717_v62 = vpop.permute.xlu1 %716 }
 0xabc   :  { %v719_v63 = vmul.f32 %v717_v62, %v710_v56 }
 0xabe   :  { %721 = vrot.lane.b32.xlu0 %v719_v63, %s1567_s18 }
 0xb10   :  { %v783_v1 = vpop.permute.xlu1 %782 }
 0xb11   :  { %v1791_v3 = vadd.f32 %v783_v1, %v775_v54 }
 0xb13   :  { %1486 = vtanh.f32 %v1791_v3 }
 0xb19   :  { %v1487_v50 = vpop.eup %1486 }
 0xb1a   :  { %788 = vrot.lane.b32.xlu0 %v1487_v50, %s1566_s17 }
 0xb30   :  { %v722_v7 = vpop.permute.xlu0 %721 }
 0xb31   :  { %v1796_v9 = vadd.f32 %v722_v7, %v714_v4 }
 0xb33   :  { %1488 = vtanh.f32 %v1796_v9 }
 0xb39   :  { %v1489_v10 = vpop.eup %1488 }
 0xb3a   :  { %727 = vrot.lane.b32.xlu2 %v1489_v10, %s1566_s17 }
 0xb8c   :  { %v789_v11 = vpop.permute.xlu0 %788 }
 0xb8d   :  { %v791_v12 = vmul.f32 %v789_v11, %v771_v44 }
 0xb8f   :  { %818 = vrot.lane.b32.xlu2 %v791_v12, %s1567_s18 }
 0xb94   :  { %v728_v13 = vpop.permute.xlu2 %727 }
 0xb95   :  { %v730_v61 = vmul.f32 %v728_v13, %v710_v56  ;;  %v36_v13 = vld [vmem:[%s1900_s0 + $0x30] sm:$0xff] }
 0xb96   :  { %1373 = vmatmul.msk.f32.gmra.mxu0 %vm38_vm0, %v36_v13 }
 0xb97   :  { %793 = vrot.lane.b32.xlu1 %v730_v61, %s1567_s18 }
 0xbe9   :  { %v819_v14 = vpop.permute.xlu2 %818 }
 0xbea   :  { %1405 = vmatmul.msk.f32.vlgmr.msra.gmra.mxu3 %vm134_vm5, %v819_v14  ;;  %1408 = vmatmul.msk.f32.vlgmr.msrb.gmra.mxu1 %vm134_vm5, %v819_v14 }
 0xbeb   :  { %1134 = vmatpush.msra.mxu3 %v1622_v35  ;;  %1195 = vmatpush.msrb.mxu1 %v1586_v0  ;;  %v95_v0 = vpop.f32.mrf.mxu0 }
 0xbed   :  { %1135 = vmatpush.msra.mxu3 %v1628_v37  ;;  %1196 = vmatpush.msrb.mxu1 %v1588_v2  ;;  %v109_v2 = vadd.f32 %v95_v0, %v1611_v8  ;;  %v1532_v0 = vld [vmem:[#allocation3 + $0x70] sm:$0xff] }
 0xbef   :  { %1136 = vmatpush.msra.mxu3 %v1632_v39  ;;  %1197 = vmatpush.msrb.mxu1 %v1594_v5 }
 0xbf1   :  { %1137 = vmatpush.msra.mxu3 %v1642_v42  ;;  %1198 = vmatpush.msrb.mxu1 %v1598_v6 }
 0xc09   :  { %v794_v15 = vpop.permute.xlu1 %793 }
 0xc0a   :  { %1404 = vmatmul.msk.f32.vlgmr.msra.gmra.mxu2 %vm134_vm5, %v794_v15 }
 0xc0b   :  { %1109 = vmatpush.msra.mxu2 %v1620_v34 }
 0xc0d   :  { %1110 = vmatpush.msra.mxu2 %v1624_v36 }
 0xc0f   :  { %1111 = vmatpush.msra.mxu2 %v1630_v38 }
 0xc11   :  { %1112 = vmatpush.msra.mxu2 %v1640_v41 }
 0xc67   :  { %v900_v16 = vpop.f32.mrf.mxu1 }
 0xc68   :  { %v903_v5 = vadd.f32 %v900_v16, %v109_v2  ;;  %v1533_v2 = vld [vmem:[#allocation3 + $0x68] sm:$0xff]  ;;  %v98_v16 = vpop.f32.mrf.mxu0 }
 0xc6a   :  { %v1409_v17 = vmul.f32 -1.442695, %v903_v5  ;;  %v1852_v5 = vld [vmem:[#allocation3 + $0x30] sm:$0xff] }
 0xc6c   :  { %1490 = vpow2.f32 %v1409_v17 }
 0xc6d   :  { %v839_v28 = vpop.f32.mrf.mxu3 }
 0xc72   :  { %v1491_v18 = vpop.eup %1490 }
 0xc73   :  { %v907_v6 = vadd.f32 1.0, %v1491_v18 }
 0xc75   :  { %1492 = vrcp.f32 %v907_v6  ;;  %v919_v34 = vand.u32 2147483648, %v907_v6  ;;  %v917_v36 = vand.u32 2147483647, %v907_v6  ;;  %vm913_vm11 = vweird.f32 %v907_v6 }
 0xc77   :  { %v920_v24 = vor.u32 1.1754944e-38, %v919_v34  ;;  %vm918_vm13 = vcmp.eq.f32.partialorder %v917_v36, 8.507059e+37 }
 0xc7b   :  { %v1493_v19 = vpop.eup %1492 }
 0xc7c   :  { %v909_v20 = vmul.f32 %v1493_v19, %v907_v6  ;;  %vm914_vm10 = vweird.f32 %v1493_v19 }
 0xc7d   :  { %vm915_vm12 = vmor %vm913_vm11, %vm914_vm10 }
 0xc7e   :  { %v910_v21 = vsub.f32 1.0, %v909_v20 }
 0xc80   :  { %v911_v22 = vmul.f32 %v1493_v19, %v910_v21 }
 0xc82   :  { %v912_v23 = vadd.f32 %v1493_v19, %v911_v22 }
 0xc84   :  { %v916_v25 = vsel %vm915_vm12, %v1493_v19, %v912_v23 }
 0xc85   :  { %v921_v8 = vsel %vm918_vm13, %v920_v24, %v916_v25 }
 0xc86   :  { %v923_v26 = vmul.f32 2.0, %v921_v8  ;;  %v925_v54 = vmul.f32 %v921_v8, %v1791_v3 }
 0xc88   :  { %v1410_v27 = vadd.f32 -1.0, %v923_v26 }
 0xc8a   :  { %927 = vrot.lane.b32.xlu1 %v1410_v27, %s1566_s17 }
 0xc8d   :  { %v814_v29 = vpop.f32.mrf.mxu2 }
 0xc8e   :  { %v840_v30 = vadd.f32 %v839_v28, %v814_v29 }
 0xc90   :  { %v842_v31 = vadd.f32 %v840_v30, %v1673_v52 }
 0xc92   :  { %v1406_v40 = vmul.f32 -1.442695, %v842_v31 }
 0xc94   :  { %1494 = vpow2.f32 %v1406_v40 }
 0xc9a   :  { %v1495_v43 = vpop.eup %1494 }
 0xc9b   :  { %v846_v44 = vadd.f32 1.0, %v1495_v43 }
 0xc9d   :  { %1496 = vrcp.f32 %v846_v44  ;;  %v858_v49 = vand.u32 2147483648, %v846_v44  ;;  %v856_v51 = vand.u32 2147483647, %v846_v44  ;;  %vm852_vm15 = vweird.f32 %v846_v44 }
 0xc9f   :  { %v859_v55 = vor.u32 1.1754944e-38, %v858_v49  ;;  %vm857_vm2 = vcmp.eq.f32.partialorder %v856_v51, 8.507059e+37 }
 0xca3   :  { %v1497_v46 = vpop.eup %1496 }
 0xca4   :  { %v848_v47 = vmul.f32 %v1497_v46, %v846_v44  ;;  %vm853_vm14 = vweird.f32 %v1497_v46 }
 0xca5   :  { %vm854_vm1 = vmor %vm852_vm15, %vm853_vm14 }
 0xca6   :  { %v849_v48 = vsub.f32 1.0, %v848_v47 }
 0xca8   :  { %v850_v32 = vmul.f32 %v1497_v46, %v849_v48 }
 0xcaa   :  { %v851_v53 = vadd.f32 %v1497_v46, %v850_v32 }
 0xcac   :  { %v855_v33 = vsel %vm854_vm1, %v1497_v46, %v851_v53 }
 0xcad   :  { %v860_v56 = vsel %vm857_vm2, %v859_v55, %v855_v33 }
 0xcae   :  { %v862_v57 = vmul.f32 2.0, %v860_v56  ;;  %v864_v7 = vmul.f32 %v860_v56, %v1796_v9 }
 0xcb0   :  { %v1407_v45 = vadd.f32 -1.0, %v862_v57 }
 0xcb2   :  { %866 = vrot.lane.b32.xlu0 %v1407_v45, %s1566_s17 }
 0xcfc   :  { %v928_v59 = vpop.permute.xlu1 %927 }
 0xcfd   :  { %v930_v60 = vmul.f32 %v928_v59, %v921_v8 }
 0xcff   :  { %932 = vrot.lane.b32.xlu0 %v930_v60, %s1567_s18 }
 0xd24   :  { %v867_v62 = vpop.permute.xlu0 %866 }
 0xd25   :  { %v869_v63 = vmul.f32 %v867_v62, %v860_v56 }
 0xd27   :  { %871 = vrot.lane.b32.xlu2 %v869_v63, %s1567_s18 }
 0xd71   :  { %v933_v1 = vpop.permute.xlu0 %932 }
 0xd72   :  { %v1828_v50 = vadd.f32 %v933_v1, %v925_v54 }
 0xd74   :  { %1498 = vtanh.f32 %v1828_v50 }
 0xd7a   :  { %v1499_v4 = vpop.eup %1498 }
 0xd7b   :  { %938 = vrot.lane.b32.xlu2 %v1499_v4, %s1566_s17 }
 0xd81   :  { %v872_v10 = vpop.permute.xlu2 %871 }
 0xd82   :  { %v1833_v58 = vadd.f32 %v872_v10, %v864_v7 }
 0xd84   :  { %1500 = vtanh.f32 %v1833_v58 }
 0xd8a   :  { %v1501_v11 = vpop.eup %1500 }
 0xd8b   :  { %877 = vrot.lane.b32.xlu1 %v1501_v11, %s1566_s17  ;;  %v37_v11 = vld [vmem:[%s1900_s0 + $0x38] sm:$0xff] }
 0xd8c   :  { %1374 = vmatmul.msk.f32.gmra.mxu0 %vm38_vm0, %v37_v11 }
 0xdd5   :  { %v939_v12 = vpop.permute.xlu2 %938 }
 0xdd6   :  { %v941_v3 = vmul.f32 %v939_v12, %v921_v8 }
 0xdd8   :  { %968 = vrot.lane.b32.xlu1 %v941_v3, %s1567_s18 }
 0xdfd   :  { %v878_v61 = vpop.permute.xlu1 %877 }
 0xdfe   :  { %v880_v9 = vmul.f32 %v878_v61, %v860_v56 }
 0xe00   :  { %943 = vrot.lane.b32.xlu0 %v880_v9, %s1567_s18 }
 0xe09   :  { %v101_v61 = vpop.f32.mrf.mxu0 }
 0xe0a   :  { %v111_v9 = vadd.f32 %v1852_v5, %v101_v61 }
 0xe4a   :  { %v969_v14 = vpop.permute.xlu1 %968 }
 0xe4b   :  { %1412 = vmatmul.msk.f32.vlgmr.msrb.gmra.mxu3 %vm134_vm5, %v969_v14  ;;  %1415 = vmatmul.msk.f32.vlgmr.msra.gmra.mxu1 %vm134_vm5, %v969_v14 }
 0xe4c   :  { %1284 = vmatpush.msrb.mxu3 %v1622_v35  ;;  %v110_v35 = vadd.f32 %v1852_v5, %v98_v16 }
 0xe4e   :  { %1285 = vmatpush.msrb.mxu3 %v1628_v37 }
 0xe50   :  { %1286 = vmatpush.msrb.mxu3 %v1632_v39 }
 0xe52   :  { %1287 = vmatpush.msrb.mxu3 %v1642_v42 }
 0xe72   :  { %v944_v15 = vpop.permute.xlu0 %943 }
 0xe73   :  { %1411 = vmatmul.msk.f32.vlgmr.msrb.gmra.mxu2 %vm134_vm5, %v944_v15 }
 0xe74   :  { %1259 = vmatpush.msrb.mxu2 %v1532_v0 }
 0xe76   :  { %1260 = vmatpush.msrb.mxu2 %v1533_v2 }
 0xe78   :  { %1261 = vmatpush.msrb.mxu2 %v1630_v38 }
 0xe7a   :  { %1262 = vmatpush.msrb.mxu2 %v1640_v41 }
 0xec8   :  { %v1050_v37 = vpop.f32.mrf.mxu1 }
 0xec9   :  { %v1053_v39 = vadd.f32 %v1050_v37, %v110_v35 }
 0xecb   :  { %v1416_v17 = vmul.f32 -1.442695, %v1053_v39 }
 0xecd   :  { %1502 = vpow2.f32 %v1416_v17 }
 0xece   :  { %v989_v8 = vpop.f32.mrf.mxu3 }
 0xed3   :  { %v1503_v42 = vpop.eup %1502 }
 0xed4   :  { %v1057_v18 = vadd.f32 1.0, %v1503_v42 }
 0xed6   :  { %1504 = vrcp.f32 %v1057_v18  ;;  %v1069_v21 = vand.u32 2147483648, %v1057_v18  ;;  %v1067_v38 = vand.u32 2147483647, %v1057_v18  ;;  %vm1063_vm4 = vweird.f32 %v1057_v18 }
 0xed8   :  { %v1070_v22 = vor.u32 1.1754944e-38, %v1069_v21  ;;  %vm1068_vm7 = vcmp.eq.f32.partialorder %v1067_v38, 8.507059e+37 }
 0xedc   :  { %v1505_v6 = vpop.eup %1504 }
 0xedd   :  { %v1059_v19 = vmul.f32 %v1505_v6, %v1057_v18  ;;  %vm1064_vm3 = vweird.f32 %v1505_v6 }
 0xede   :  { %vm1065_vm6 = vmor %vm1063_vm4, %vm1064_vm3 }
 0xedf   :  { %v1060_v20 = vsub.f32 1.0, %v1059_v19 }
 0xee1   :  { %v1061_v34 = vmul.f32 %v1505_v6, %v1060_v20 }
 0xee3   :  { %v1062_v41 = vadd.f32 %v1505_v6, %v1061_v34 }
 0xee5   :  { %v1066_v36 = vsel %vm1065_vm6, %v1505_v6, %v1062_v41 }
 0xee6   :  { %v1071_v23 = vsel %vm1068_vm7, %v1070_v22, %v1066_v36  ;;  %v1535_v22 = vld [vmem:[#allocation3 + $0x78] sm:$0xff] }
 0xee7   :  { %v1073_v24 = vmul.f32 2.0, %v1071_v23  ;;  %v1075_v59 = vmul.f32 %v1071_v23, %v1828_v50 }
 0xee9   :  { %v1417_v25 = vadd.f32 -1.0, %v1073_v24 }
 0xeeb   :  { %1077 = vrot.lane.b32.xlu0 %v1417_v25, %s1566_s17 }
 0xef6   :  { %v964_v26 = vpop.f32.mrf.mxu2 }
 0xef7   :  { %v990_v27 = vadd.f32 %v989_v8, %v964_v26 }
 0xef9   :  { %v992_v28 = vadd.f32 %v990_v27, %v1673_v52 }
 0xefb   :  { %v1413_v29 = vmul.f32 -1.442695, %v992_v28 }
 0xefd   :  { %1506 = vpow2.f32 %v1413_v29 }
 0xf03   :  { %v1507_v30 = vpop.eup %1506 }
 0xf04   :  { %v996_v31 = vadd.f32 1.0, %v1507_v30 }
 0xf06   :  { %1508 = vrcp.f32 %v996_v31  ;;  %v1008_v46 = vand.u32 2147483648, %v996_v31  ;;  %v1006_v48 = vand.u32 2147483647, %v996_v31  ;;  %vm1002_vm9 = vweird.f32 %v996_v31 }
 0xf08   :  { %v1009_v32 = vor.u32 1.1754944e-38, %v1008_v46  ;;  %vm1007_vm11 = vcmp.eq.f32.partialorder %v1006_v48, 8.507059e+37 }
 0xf0c   :  { %v1509_v40 = vpop.eup %1508 }
 0xf0d   :  { %v998_v43 = vmul.f32 %v1509_v40, %v996_v31  ;;  %vm1003_vm8 = vweird.f32 %v1509_v40 }
 0xf0e   :  { %vm1004_vm10 = vmor %vm1002_vm9, %vm1003_vm8 }
 0xf0f   :  { %v999_v44 = vsub.f32 1.0, %v998_v43 }
 0xf11   :  { %v1000_v47 = vmul.f32 %v1509_v40, %v999_v44 }
 0xf13   :  { %v1001_v49 = vadd.f32 %v1509_v40, %v1000_v47 }
 0xf15   :  { %v1005_v51 = vsel %vm1004_vm10, %v1509_v40, %v1001_v49 }
 0xf16   :  { %v1010_v53 = vsel %vm1007_vm11, %v1009_v32, %v1005_v51 }
 0xf17   :  { %v1012_v52 = vmul.f32 2.0, %v1010_v53  ;;  %v1014_v54 = vmul.f32 %v1010_v53, %v1833_v58 }
 0xf19   :  { %v1414_v55 = vadd.f32 -1.0, %v1012_v52 }
 0xf1b   :  { %1016 = vrot.lane.b32.xlu2 %v1414_v55, %s1566_s17 }
 0xf5d   :  { %v1078_v33 = vpop.permute.xlu0 %1077 }
 0xf5e   :  { %v1080_v56 = vmul.f32 %v1078_v33, %v1071_v23 }
 0xf60   :  { %1082 = vrot.lane.b32.xlu2 %v1080_v56, %s1567_s18 }
 0xf75   :  { %v1017_v57 = vpop.permute.xlu2 %1016 }
 0xf76   :  { %v1019_v45 = vmul.f32 %v1017_v57, %v1010_v53 }
 0xf78   :  { %1021 = vrot.lane.b32.xlu1 %v1019_v45, %s1567_s18 }
 0xfba   :  { %v1083_v60 = vpop.permute.xlu2 %1082 }
 0xfbb   :  { %v1861_v62 = vadd.f32 %v1083_v60, %v1075_v59 }
 0xfbd   :  { %1510 = vtanh.f32 %v1861_v62 }
 0xfc3   :  { %v1511_v63 = vpop.eup %1510 }
 0xfc4   :  { %1088 = vrot.lane.b32.xlu1 %v1511_v63, %s1566_s17 }
 0xfea   :  { %v1022_v1 = vpop.permute.xlu1 %1021 }
 0xfeb   :  { %v1866_v4 = vadd.f32 %v1022_v1, %v1014_v54 }
 0xfed   :  { %1512 = vtanh.f32 %v1866_v4 }
 0xff3   :  { %v1513_v7 = vpop.eup %1512 }
 0xff4   :  { %1027 = vrot.lane.b32.xlu0 %v1513_v7, %s1566_s17 }
0x1036   :  { %v1089_v10 = vpop.permute.xlu1 %1088 }
0x1037   :  { %v1091_v50 = vmul.f32 %v1089_v10, %v1071_v23 }
0x1039   :  { %1118 = vrot.lane.b32.xlu0 %v1091_v50, %s1567_s18 }
0x1066   :  { %v1028_v12 = vpop.permute.xlu0 %1027 }
0x1067   :  { %v1030_v58 = vmul.f32 %v1028_v12, %v1010_v53 }
0x1069   :  { %1093 = vrot.lane.b32.xlu2 %v1030_v58, %s1567_s18 }
0x10ab   :  { %v1119_v3 = vpop.permute.xlu0 %1118 }
0x10ac   :  { %1419 = vmatmul.msk.f32.vlgmr.msra.gmra.mxu3 %vm134_vm5, %v1119_v3  ;;  %1422 = vmatmul.msk.f32.vlgmr.msrb.gmra.mxu1 %vm134_vm5, %v1119_v3 }
0x10c3   :  { %v1094_v13 = vpop.permute.xlu2 %1093 }
0x10c4   :  { %1418 = vmatmul.msk.f32.vlgmr.msra.gmra.mxu2 %vm134_vm5, %v1094_v13 }
0x1129   :  { %v1200_v14 = vpop.f32.mrf.mxu1 }
0x112a   :  { %v1203_v15 = vadd.f32 %v1200_v14, %v111_v9 }
0x112c   :  { %v1423_v0 = vmul.f32 -1.442695, %v1203_v15 }
0x112e   :  { %1514 = vpow2.f32 %v1423_v0 }
0x112f   :  { %v1139_v5 = vpop.f32.mrf.mxu3 }
0x1134   :  { %v1515_v2 = vpop.eup %1514 }
0x1135   :  { %v1207_v16 = vadd.f32 1.0, %v1515_v2 }
0x1137   :  { %1516 = vrcp.f32 %v1207_v16  ;;  %v1219_v17 = vand.u32 2147483648, %v1207_v16  ;;  %v1217_v18 = vand.u32 2147483647, %v1207_v16  ;;  %vm1213_vm12 = vweird.f32 %v1207_v16 }
0x1139   :  { %v1220_v19 = vor.u32 1.1754944e-38, %v1219_v17  ;;  %vm1218_vm14 = vcmp.eq.f32.partialorder %v1217_v18, 8.507059e+37 }
0x113d   :  { %v1517_v35 = vpop.eup %1516 }
0x113e   :  { %v1209_v37 = vmul.f32 %v1517_v35, %v1207_v16  ;;  %vm1214_vm0 = vweird.f32 %v1517_v35 }
0x113f   :  { %vm1215_vm13 = vmor %vm1213_vm12, %vm1214_vm0 }
0x1140   :  { %v1210_v39 = vsub.f32 1.0, %v1209_v37 }
0x1142   :  { %v1211_v42 = vmul.f32 %v1517_v35, %v1210_v39 }
0x1144   :  { %v1212_v6 = vadd.f32 %v1517_v35, %v1211_v42 }
0x1146   :  { %v1216_v20 = vsel %vm1215_vm13, %v1517_v35, %v1212_v6 }
0x1147   :  { %v1114_v21 = vpop.f32.mrf.mxu2  ;;  %v1221_v34 = vsel %vm1218_vm14, %v1220_v19, %v1216_v20 }
0x1148   :  { %v1140_v38 = vadd.f32 %v1139_v5, %v1114_v21  ;;  %v1223_v41 = vmul.f32 2.0, %v1221_v34  ;;  %v1225_v52 = vmul.f32 %v1221_v34, %v1861_v62 }
0x114a   :  { %v1142_v36 = vadd.f32 %v1535_v22, %v1140_v38  ;;  %v1424_v23 = vadd.f32 -1.0, %v1223_v41  ;;  %v1333_v38 = vld [vmem:[#allocation3 + $0x90] sm:$0xff]  ;;  %v1332_v41 = vld [vmem:[#allocation3 + $0x88] sm:$0xff] }
0x114c   :  { %v1420_v24 = vmul.f32 -1.442695, %v1142_v36  ;;  %1227 = vrot.lane.b32.xlu2 %v1424_v23, %s1566_s17 }
0x114e   :  { %1518 = vpow2.f32 %v1420_v24 }
0x1154   :  { %v1519_v25 = vpop.eup %1518 }
0x1155   :  { %v1146_v8 = vadd.f32 1.0, %v1519_v25  ;;  %v1335_v25 = vld [vmem:[#allocation3 + $0xa0] sm:$0xff] }
0x1157   :  { %1520 = vrcp.f32 %v1146_v8  ;;  %v1158_v29 = vand.u32 2147483648, %v1146_v8  ;;  %v1156_v31 = vand.u32 2147483647, %v1146_v8  ;;  %vm1152_vm1 = vweird.f32 %v1146_v8 }
0x1159   :  { %v1159_v43 = vor.u32 1.1754944e-38, %v1158_v29  ;;  %vm1157_vm3 = vcmp.eq.f32.partialorder %v1156_v31, 8.507059e+37 }
0x115d   :  { %v1521_v26 = vpop.eup %1520 }
0x115e   :  { %v1148_v27 = vmul.f32 %v1521_v26, %v1146_v8  ;;  %vm1153_vm15 = vweird.f32 %v1521_v26 }
0x115f   :  { %vm1154_vm2 = vmor %vm1152_vm1, %vm1153_vm15 }
0x1160   :  { %v1149_v28 = vsub.f32 1.0, %v1148_v27 }
0x1162   :  { %v1150_v30 = vmul.f32 %v1521_v26, %v1149_v28 }
0x1164   :  { %v1151_v40 = vadd.f32 %v1521_v26, %v1150_v30 }
0x1166   :  { %v1155_v44 = vsel %vm1154_vm2, %v1521_v26, %v1151_v40 }
0x1167   :  { %v1160_v46 = vsel %vm1157_vm3, %v1159_v43, %v1155_v44 }
0x1168   :  { %v1162_v47 = vmul.f32 2.0, %v1160_v46  ;;  %v1164_v57 = vmul.f32 %v1160_v46, %v1866_v4 }
0x116a   :  { %v1421_v48 = vadd.f32 -1.0, %v1162_v47 }
0x116c   :  { %1166 = vrot.lane.b32.xlu1 %v1421_v48, %s1566_s17 }
0x11a6   :  { %v1228_v49 = vpop.permute.xlu2 %1227 }
0x11a7   :  { %v1230_v32 = vmul.f32 %v1228_v49, %v1221_v34 }
0x11a9   :  { %1232 = vrot.lane.b32.xlu1 %v1230_v32, %s1567_s18 }
0x11de   :  { %v1167_v51 = vpop.permute.xlu1 %1166 }
0x11df   :  { %v1169_v53 = vmul.f32 %v1167_v51, %v1160_v46 }
0x11e1   :  { %1171 = vrot.lane.b32.xlu0 %v1169_v53, %s1567_s18 }
0x121b   :  { %v1233_v55 = vpop.permute.xlu1 %1232 }
0x121c   :  { %v1235_v33 = vadd.f32 %v1233_v55, %v1225_v52 }
0x121e   :  { %1522 = vtanh.f32 %v1235_v33 }
0x1224   :  { %v1523_v56 = vpop.eup %1522 }
0x1225   :  { %1238 = vrot.lane.b32.xlu0 %v1523_v56, %s1566_s17 }
0x1253   :  { %v1172_v45 = vpop.permute.xlu0 %1171 }
0x1254   :  { %v1174_v59 = vadd.f32 %v1172_v45, %v1164_v57 }
0x1256   :  { %1524 = vtanh.f32 %v1174_v59 }
0x125c   :  { %v1525_v60 = vpop.eup %1524 }
0x125d   :  { %1177 = vrot.lane.b32.xlu2 %v1525_v60, %s1566_s17 }
0x1297   :  { %v1239_v63 = vpop.permute.xlu0 %1238 }
0x1298   :  { %v1241_v54 = vmul.f32 %v1239_v63, %v1221_v34  ;;  %v1334_v34 = vld [vmem:[#allocation3 + $0x98] sm:$0xff] }
0x1299   :  { %1353 = vmatpush.msrb.mxu0 %v1334_v34 }
0x129a   :  { %1268 = vrot.lane.b32.xlu2 %v1241_v54, %s1567_s18 }
0x129b   :  { %1354 = vmatpush.msrb.mxu0 %v1333_v38 }
0x129d   :  { %1355 = vmatpush.msrb.mxu0 %v1332_v41 }
0x12b7   :  { %v1178_v1 = vpop.permute.xlu2 %1177 }
0x12b8   :  { %v1180_v62 = vmul.f32 %v1178_v1, %v1160_v46 }
0x12ba   :  { %1243 = vrot.lane.b32.xlu1 %v1180_v62, %s1567_s18 }
0x12f4   :  { %v1269_v7 = vpop.permute.xlu2 %1268 }
0x12f5   :  { %1426 = vmatmul.msk.f32.vlgmr.msrb.gmra.mxu3 %vm134_vm5, %v1269_v7 }
0x132c   :  { %v1244_v10 = vpop.permute.xlu1 %1243 }
0x132d   :  { %1425 = vmatmul.msk.f32.vlgmr.msrb.gmra.mxu2 %vm134_vm5, %v1244_v10 }
0x1378   :  { %v1289_v4 = vpop.f32.mrf.mxu3 }
0x13b0   :  { %v1264_v50 = vpop.f32.mrf.mxu2 }
0x13b1   :  { %v1290_v11 = vadd.f32 %v1289_v4, %v1264_v50 }
0x13b3   :  { %v1292_v12 = vadd.f32 %v1535_v22, %v1290_v11  ;;  %v1331_v22 = vld [vmem:[#allocation3 + $0x80] sm:$0xff] }
0x13b4   :  { %1356 = vmatpush.msrb.mxu0 %v1331_v22 }
0x13b5   :  { %v1427_v58 = vmul.f32 -1.442695, %v1292_v12 }
0x13b7   :  { %1526 = vpow2.f32 %v1427_v58 }
0x13bd   :  { %v1527_v3 = vpop.eup %1526 }
0x13be   :  { %v1296_v13 = vadd.f32 1.0, %v1527_v3 }
0x13c0   :  { %1528 = vrcp.f32 %v1296_v13  ;;  %v1308_v15 = vand.u32 2147483648, %v1296_v13  ;;  %v1306_v2 = vand.u32 2147483647, %v1296_v13  ;;  %vm1302_vm6 = vweird.f32 %v1296_v13 }
0x13c2   :  { %v1309_v35 = vor.u32 1.1754944e-38, %v1308_v15  ;;  %vm1307_vm8 = vcmp.eq.f32.partialorder %v1306_v2, 8.507059e+37 }
0x13c6   :  { %v1529_v61 = vpop.eup %1528 }
0x13c7   :  { %v1298_v9 = vmul.f32 %v1529_v61, %v1296_v13  ;;  %vm1303_vm4 = vweird.f32 %v1529_v61 }
0x13c8   :  { %vm1304_vm7 = vmor %vm1302_vm6, %vm1303_vm4 }
0x13c9   :  { %v1299_v14 = vsub.f32 1.0, %v1298_v9 }
0x13cb   :  { %v1300_v0 = vmul.f32 %v1529_v61, %v1299_v14 }
0x13cd   :  { %v1301_v16 = vadd.f32 %v1529_v61, %v1300_v0 }
0x13cf   :  { %v1305_v37 = vsel %vm1304_vm7, %v1529_v61, %v1301_v16 }
0x13d0   :  { %v1310_v39 = vsel %vm1307_vm8, %v1309_v35, %v1305_v37 }
0x13d1   :  { %v1312_v17 = vmul.f32 2.0, %v1310_v39  ;;  %v1314_v19 = vmul.f32 %v1310_v39, %v1174_v59 }
0x13d3   :  { %v1428_v42 = vadd.f32 -1.0, %v1312_v17 }
0x13d5   :  { %1316 = vrot.lane.b32.xlu0 %v1428_v42, %s1566_s17 }
0x1447   :  { %v1317_v18 = vpop.permute.xlu0 %1316 }
0x1448   :  { %v1319_v6 = vmul.f32 %v1317_v18, %v1310_v39 }
0x144a   :  { %1321 = vrot.lane.b32.xlu1 %v1319_v6, %s1567_s18 }
0x14bc   :  { %v1322_v20 = vpop.permute.xlu1 %1321 }
0x14bd   :  { %v1324_v5 = vadd.f32 %v1322_v20, %v1314_v19 }
0x14bf   :  { %1530 = vtanh.f32 %v1324_v5 }
0x14c5   :  { %v1531_v21 = vpop.eup %1530 }
0x14c6   :  { %1327 = vrot.lane.b32.xlu2 %v1531_v21, %s1566_s17 }
0x1520   :  { %v1328_v36 = vpop.permute.xlu2 %1327 }
0x1521   :  { %v1330_v23 = vmul.f32 %v1328_v36, %v1310_v39 }
0x1523   :  { %1337 = vrot.lane.b32.xlu0 %v1330_v23, %s1567_s18 }
0x1595   :  { %v1338_v24 = vpop.permute.xlu0 %1337 }
0x1596   :  { %1429 = vmatmul.msk.f32.vlgmr.msrb.gmra.mxu0 %vm134_vm5, %v1338_v24 }
0x1613   :  { %v1358_v8 = vpop.f32.mrf.mxu0 }
0x1614   :  { %v1359_v26 = vadd.f32 %v1358_v8, %v1335_v25 }
0x1616   :  { %1361 = vst [vmem:[%s1902_s2] sm:$0xff] %v1359_v26 }
0x1617   :  { %1366 = vsyncpa [#allocation4], 1 }

</bundles_post_ra>
